<compile_context>
chip_gen: v7x
topology: tpu7x:2x2x1
jax: 0.10.0
libtpu: 0.0.40
codegen_flags: <defaults>
</compile_context>

<pallas_src>
import math
import functools

import jax
import jax.numpy as jnp
from jax import lax
from jax.experimental import pallas as pl
from jax.experimental.pallas import tpu as pltpu


def _attn_layer_kernel(hidden_ref, mask_ref,
                       wq_ref, bq_ref, wk_ref, bk_ref,
                       wv_ref, bv_ref, wo_ref, bo_ref,
                       out_ref, ctx_ref, *, heads_num, per_head_size):
    """One multi-head self-attention layer for a single batch element.

    hidden_ref: [1, S, H] f32       mask_ref: [1, 1, S] f32 additive mask row
    wq/wk/wv:   [heads, H, d] bf16  bq/bk/bv: [heads, 1, d] f32
    wo:         [H, H] bf16         bo:       [1, H] f32
    ctx_ref:    [S, H] bf16 VMEM scratch (per-head contexts written in place)
    """
    x = hidden_ref[0].astype(jnp.bfloat16)        # [S, H] bf16 MXU operand
    m = mask_ref[0]                               # [1, S] f32, broadcasts over query rows
    scale = 1.0 / math.sqrt(float(per_head_size))

    for h in range(heads_num):                    # static unroll over heads
        # Per-head projections straight from head-major weights (no lane slicing
        # of a packed [S, H] Q/K/V).  Accumulate in f32, add f32 bias.
        q = jnp.dot(x, wq_ref[h], preferred_element_type=jnp.float32) + bq_ref[h]
        k = jnp.dot(x, wk_ref[h], preferred_element_type=jnp.float32) + bk_ref[h]
        v = jnp.dot(x, wv_ref[h], preferred_element_type=jnp.float32) + bv_ref[h]
        q = q * scale                             # fold 1/sqrt(d) into q (S*d muls, not S*S)

        # Scores: contract the head dim of q and k directly (no kh.T transpose).
        s = lax.dot_general(q.astype(jnp.bfloat16), k.astype(jnp.bfloat16),
                            dimension_numbers=(((1,), (1,)), ((), ())),
                            preferred_element_type=jnp.float32)      # [S, S] f32
        s = s + m                                 # additive key mask, broadcast over rows

        # Numerically-stable softmax over the key axis (f32 stats).
        s = s - jnp.max(s, axis=-1, keepdims=True)
        p = jnp.exp(s)
        p = p * pl.reciprocal(jnp.sum(p, axis=-1, keepdims=True), approx=True)
        # dropout(probs) is identity in eval mode.

        ctx_h = jnp.dot(p.astype(jnp.bfloat16), v.astype(jnp.bfloat16),
                        preferred_element_type=jnp.float32)          # [S, d] f32
        lo = h * per_head_size
        ctx_ref[:, lo:lo + per_head_size] = ctx_h.astype(jnp.bfloat16)

    # Output projection over the assembled [S, H] context.
    out = jnp.dot(ctx_ref[...], wo_ref[...],
                  preferred_element_type=jnp.float32) + bo_ref[...]
    out_ref[0] = out.astype(out_ref.dtype)


def _attn_layer(hidden, add_mask, prepped, heads_num):
    """hidden: [B,S,H] f32, add_mask: [B,1,S] f32, prepped: head-major bf16 weights."""
    B, S, H = hidden.shape
    d = H // heads_num
    wq, bq, wk, bk, wv, bv, wo, bo = prepped

    kern = functools.partial(_attn_layer_kernel,
                             heads_num=heads_num, per_head_size=d)

    const3 = lambda b: (0, 0, 0)
    const2 = lambda b: (0, 0)

    # Weight/bias index maps are constant -> the pipeline does not re-DMA them
    # across grid steps.  (Single-buffering them via pipeline_mode would only
    # reduce their VMEM allocation further.)
    return pl.pallas_call(
        kern,
        out_shape=jax.ShapeDtypeStruct((B, S, H), jnp.float32),
        grid_spec=pltpu.PrefetchScalarGridSpec(
            num_scalar_prefetch=0,
            grid=(B,),
            in_specs=[
                pl.BlockSpec((1, S, H), lambda b: (b, 0, 0)),        # hidden
                pl.BlockSpec((1, 1, S), lambda b: (b, 0, 0)),        # additive mask row
                pl.BlockSpec((heads_num, H, d), const3),             # Wq (head-major)
                pl.BlockSpec((heads_num, 1, d), const3),             # bq
                pl.BlockSpec((heads_num, H, d), const3),             # Wk
                pl.BlockSpec((heads_num, 1, d), const3),             # bk
                pl.BlockSpec((heads_num, H, d), const3),             # Wv
                pl.BlockSpec((heads_num, 1, d), const3),             # bv
                pl.BlockSpec((H, H), const2),                        # Wo
                pl.BlockSpec((1, H), const2),                        # bo
            ],
            out_specs=pl.BlockSpec((1, S, H), lambda b: (b, 0, 0)),
            scratch_shapes=[pltpu.VMEM((S, H), jnp.bfloat16)],       # per-head ctx assembly
        ),
        compiler_params=pltpu.CompilerParams(
            dimension_semantics=("parallel",),
            vmem_limit_bytes=64 * 1024 * 1024,                       # fits v7x physical VMEM
        ),
    )(hidden, add_mask, wq, bq, wk, bk, wv, bv, wo, bo)


def _prep_layer_params(layer_params, heads_num):
    """Rearrange Linear params to head-major layout, bf16 weights / f32 biases."""
    wq, bq, wk, bk, wv, bv, wo, bo = layer_params
    H = wq.shape[0]
    d = H // heads_num

    def w_hm(w):   # [H, H] -> [heads, H, d]
        return w.reshape(H, heads_num, d).transpose(1, 0, 2).astype(jnp.bfloat16)

    def b_hm(b):   # [1, H] -> [heads, 1, d]
        return b.reshape(1, heads_num, d).transpose(1, 0, 2).astype(jnp.float32)

    return (w_hm(wq), b_hm(bq), w_hm(wk), b_hm(bk), w_hm(wv), b_hm(bv),
            wo.astype(jnp.bfloat16), bo.astype(jnp.float32))


def attn_encoder(emb, sequence, params, heads_num):
    """AttnEncoder.forward.

    emb:      [B, S, H] float32
    sequence: [B, S]    int (0 == padding)
    params:   list (per layer) of (Wq, bq, Wk, bk, Wv, bv, Wo, bo)
              with W* shaped [H, H] (applied as x @ W + b) and b* shaped [1, H].
    """
    B, S, H = emb.shape
    # mask = (1 - (sequence > 0).float()) * -10000, kept compact as [B, 1, S];
    # broadcast over queries/heads happens inside the kernel.
    key_mask = (sequence > 0).astype(jnp.float32)                 # [B, S]
    add_mask = (1.0 - key_mask)[:, None, :] * (-10000.0)          # [B, 1, S]

    # TODO(synk): for deep stacks, fuse all layers into one pallas_call with a
    # layer grid axis so layer i+1 weight DMA hides behind layer i compute.
    hidden = emb.astype(jnp.float32)
    for layer_params in params:
        prepped = _prep_layer_params(layer_params, heads_num)
        hidden = _attn_layer(hidden, add_mask, prepped, heads_num)
    return hidden


def _reference(emb, sequence, params, heads_num):
    """Pure-JAX f32 reference for correctness check."""
    B, S, H = emb.shape
    d = H // heads_num
    key_mask = (sequence > 0).astype(jnp.float32)
    add_mask = jnp.broadcast_to((1.0 - key_mask)[:, None, :] * -10000.0, (B, S, S))
    hidden = emb
    for (wq, bq, wk, bk, wv, bv, wo, bo) in params:
        q = hidden @ wq + bq
        k = hidden @ wk + bk
        v = hidden @ wv + bv
        q = q.reshape(B, S, heads_num, d).transpose(0, 2, 1, 3)
        k = k.reshape(B, S, heads_num, d).transpose(0, 2, 1, 3)
        v = v.reshape(B, S, heads_num, d).transpose(0, 2, 1, 3)
        s = jnp.einsum("bhqd,bhkd->bhqk", q, k) / math.sqrt(d) + add_mask[:, None]
        p = jax.nn.softmax(s, axis=-1)
        ctx = jnp.einsum("bhqk,bhkd->bhqd", p, v)
        ctx = ctx.transpose(0, 2, 1, 3).reshape(B, S, H)
        hidden = ctx @ wo + bo
    return hidden


def _init_params(key, layers_num, H):
    """Deterministic synthetic parameters (equivalent of nn.Linear weights)."""
    params = []
    for i in range(layers_num):
        ks = jax.random.split(jax.random.fold_in(key, i), 8)
        layer = []
        for j in range(4):  # q, k, v, output projections
            w = 0.02 * jax.random.normal(ks[2 * j], (H, H), jnp.float32)
            b = 0.02 * jax.random.normal(ks[2 * j + 1], (1, H), jnp.float32)
            layer += [w, b]
        params.append(tuple(layer))
    return params


if __name__ == "__main__":
    B, S, H = 2, 8, 32
    heads_num = 4
    layers_num = 2

    root = jax.random.PRNGKey(0)
    k_emb, k_seq, k_par = jax.random.split(root, 3)

    emb = jax.random.normal(k_emb, (B, S, H), jnp.float32)
    # token ids; 0 means padding (masked out)
    sequence = (jax.random.uniform(k_seq, (B, S)) > 0.25).astype(jnp.int32)
    sequence = sequence.at[:, 0].set(1)  # make sure no row is fully masked

    params = _init_params(k_par, layers_num, H)

    run = jax.jit(functools.partial(attn_encoder, heads_num=heads_num))
    out = run(emb, sequence, params)
    out = jax.block_until_ready(out)

    ref = _reference(emb, sequence, params, heads_num)
    assert out.shape == (B, S, H)
    # Tolerance reflects bf16 MXU operands (f32 accumulation / f32 softmax stats);
    # observed error is ~1e-4 absolute at these magnitudes.
    assert jnp.allclose(out, ref, atol=5e-3, rtol=5e-2), "mismatch vs reference"

    print("KERNEL_OK")
</pallas_src>

<mosaic_0001>
module attributes {stable_mosaic.version = 11 : i64} {
  func.func @_attn_layer_kernel(%arg0: i32, %arg1: memref<1x8x32xf32, #tpu.memory_space<vmem>>, %arg2: memref<1x1x8xf32, #tpu.memory_space<vmem>>, %arg3: memref<4x32x8xbf16, #tpu.memory_space<vmem>>, %arg4: memref<4x1x8xf32, #tpu.memory_space<vmem>>, %arg5: memref<4x32x8xbf16, #tpu.memory_space<vmem>>, %arg6: memref<4x1x8xf32, #tpu.memory_space<vmem>>, %arg7: memref<4x32x8xbf16, #tpu.memory_space<vmem>>, %arg8: memref<4x1x8xf32, #tpu.memory_space<vmem>>, %arg9: memref<32x32xbf16, #tpu.memory_space<vmem>>, %arg10: memref<1x32xf32, #tpu.memory_space<vmem>>, %arg11: memref<1x8x32xf32, #tpu.memory_space<vmem>>, %arg12: memref<8x32xbf16, #tpu.memory_space<vmem>>) attributes {dimension_semantics = [#tpu.dimension_semantics<parallel>], iteration_bounds = array<i64: 2>, scalar_prefetch = 0 : i64, scratch_operands = 1 : i64, tpu.core_type = #tpu.core_type<tc>, window_params = [{transform_indices = @transform_0, window_bounds = array<i64: 1, 8, 32>}, {transform_indices = @transform_1, window_bounds = array<i64: 1, 1, 8>}, {pipeline_mode = #tpu.pipeline_mode<synchronous>, transform_indices = @transform_2, window_bounds = array<i64: 4, 32, 8>}, {pipeline_mode = #tpu.pipeline_mode<synchronous>, transform_indices = @transform_3, window_bounds = array<i64: 4, 1, 8>}, {pipeline_mode = #tpu.pipeline_mode<synchronous>, transform_indices = @transform_4, window_bounds = array<i64: 4, 32, 8>}, {pipeline_mode = #tpu.pipeline_mode<synchronous>, transform_indices = @transform_5, window_bounds = array<i64: 4, 1, 8>}, {pipeline_mode = #tpu.pipeline_mode<synchronous>, transform_indices = @transform_6, window_bounds = array<i64: 4, 32, 8>}, {pipeline_mode = #tpu.pipeline_mode<synchronous>, transform_indices = @transform_7, window_bounds = array<i64: 4, 1, 8>}, {pipeline_mode = #tpu.pipeline_mode<synchronous>, transform_indices = @transform_8, window_bounds = array<i64: 32, 32>}, {pipeline_mode = #tpu.pipeline_mode<synchronous>, transform_indices = @transform_9, window_bounds = array<i64: 1, 32>}, {transform_indices = @transform_10, window_bounds = array<i64: 1, 8, 32>}]} {
    %c0 = arith.constant 0 : index
    %c0_0 = arith.constant 0 : index
    %c0_1 = arith.constant 0 : index
    %0 = vector.load %arg1[%c0, %c0_0, %c0_1] : memref<1x8x32xf32, #tpu.memory_space<vmem>>, vector<1x8x32xf32>
    %1 = vector.shape_cast %0 : vector<1x8x32xf32> to vector<8x32xf32>
    %2 = arith.truncf %1 : vector<8x32xf32> to vector<8x32xbf16>
    %c0_2 = arith.constant 0 : index
    %c0_3 = arith.constant 0 : index
    %c0_4 = arith.constant 0 : index
    %3 = vector.load %arg2[%c0_2, %c0_3, %c0_4] : memref<1x1x8xf32, #tpu.memory_space<vmem>>, vector<1x1x8xf32>
    %4 = vector.shape_cast %3 : vector<1x1x8xf32> to vector<1x8xf32>
    %c0_5 = arith.constant 0 : index
    %c0_6 = arith.constant 0 : index
    %c0_7 = arith.constant 0 : index
    %5 = vector.load %arg3[%c0_5, %c0_6, %c0_7] : memref<4x32x8xbf16, #tpu.memory_space<vmem>>, vector<1x32x8xbf16>
    %6 = vector.shape_cast %5 : vector<1x32x8xbf16> to vector<32x8xbf16>
    %cst = arith.constant dense<0.000000e+00> : vector<8x8xf32>
    %7 = tpu.matmul %2, %6, %cst {dimension_numbers = #tpu.dot_dimension_numbers<[1], [0], [0], [1], [0, 0, 1, 1], [], []>} : vector<8x32xbf16>, vector<32x8xbf16>, vector<8x8xf32> -> vector<8x8xf32>
    %c0_8 = arith.constant 0 : index
    %c0_9 = arith.constant 0 : index
    %c0_10 = arith.constant 0 : index
    %8 = vector.load %arg4[%c0_8, %c0_9, %c0_10] : memref<4x1x8xf32, #tpu.memory_space<vmem>>, vector<1x1x8xf32>
    %9 = vector.shape_cast %8 : vector<1x1x8xf32> to vector<1x8xf32>
    %10 = vector.broadcast %9 : vector<1x8xf32> to vector<8x8xf32>
    %11 = arith.addf %7, %10 : vector<8x8xf32>
    %c0_11 = arith.constant 0 : index
    %c0_12 = arith.constant 0 : index
    %c0_13 = arith.constant 0 : index
    %12 = vector.load %arg5[%c0_11, %c0_12, %c0_13] : memref<4x32x8xbf16, #tpu.memory_space<vmem>>, vector<1x32x8xbf16>
    %13 = vector.shape_cast %12 : vector<1x32x8xbf16> to vector<32x8xbf16>
    %cst_14 = arith.constant dense<0.000000e+00> : vector<8x8xf32>
    %14 = tpu.matmul %2, %13, %cst_14 {dimension_numbers = #tpu.dot_dimension_numbers<[1], [0], [0], [1], [0, 0, 1, 1], [], []>} : vector<8x32xbf16>, vector<32x8xbf16>, vector<8x8xf32> -> vector<8x8xf32>
    %c0_15 = arith.constant 0 : index
    %c0_16 = arith.constant 0 : index
    %c0_17 = arith.constant 0 : index
    %15 = vector.load %arg6[%c0_15, %c0_16, %c0_17] : memref<4x1x8xf32, #tpu.memory_space<vmem>>, vector<1x1x8xf32>
    %16 = vector.shape_cast %15 : vector<1x1x8xf32> to vector<1x8xf32>
    %17 = vector.broadcast %16 : vector<1x8xf32> to vector<8x8xf32>
    %18 = arith.addf %14, %17 : vector<8x8xf32>
    %c0_18 = arith.constant 0 : index
    %c0_19 = arith.constant 0 : index
    %c0_20 = arith.constant 0 : index
    %19 = vector.load %arg7[%c0_18, %c0_19, %c0_20] : memref<4x32x8xbf16, #tpu.memory_space<vmem>>, vector<1x32x8xbf16>
    %20 = vector.shape_cast %19 : vector<1x32x8xbf16> to vector<32x8xbf16>
    %cst_21 = arith.constant dense<0.000000e+00> : vector<8x8xf32>
    %21 = tpu.matmul %2, %20, %cst_21 {dimension_numbers = #tpu.dot_dimension_numbers<[1], [0], [0], [1], [0, 0, 1, 1], [], []>} : vector<8x32xbf16>, vector<32x8xbf16>, vector<8x8xf32> -> vector<8x8xf32>
    %c0_22 = arith.constant 0 : index
    %c0_23 = arith.constant 0 : index
    %c0_24 = arith.constant 0 : index
    %22 = vector.load %arg8[%c0_22, %c0_23, %c0_24] : memref<4x1x8xf32, #tpu.memory_space<vmem>>, vector<1x1x8xf32>
    %23 = vector.shape_cast %22 : vector<1x1x8xf32> to vector<1x8xf32>
    %24 = vector.broadcast %23 : vector<1x8xf32> to vector<8x8xf32>
    %25 = arith.addf %21, %24 : vector<8x8xf32>
    %cst_25 = arith.constant 0.353553385 : f32
    %26 = vector.broadcast %cst_25 : f32 to vector<8x8xf32>
    %27 = arith.mulf %11, %26 : vector<8x8xf32>
    %28 = arith.truncf %27 : vector<8x8xf32> to vector<8x8xbf16>
    %29 = arith.truncf %18 : vector<8x8xf32> to vector<8x8xbf16>
    %cst_26 = arith.constant dense<0.000000e+00> : vector<8x8xf32>
    %30 = tpu.matmul %28, %29, %cst_26 {dimension_numbers = #tpu.dot_dimension_numbers<[1], [1], [0], [0], [0, 0, 1, 0], [], []>} : vector<8x8xbf16>, vector<8x8xbf16>, vector<8x8xf32> -> vector<8x8xf32>
    %31 = vector.broadcast %4 : vector<1x8xf32> to vector<8x8xf32>
    %32 = arith.addf %30, %31 : vector<8x8xf32>
    %cst_27 = arith.constant dense<0xFF800000> : vector<8xf32>
    %33 = vector.multi_reduction <maximumf>, %32, %cst_27 [1] : vector<8x8xf32> to vector<8xf32>
    %34 = vector.shape_cast %33 : vector<8xf32> to vector<8x1xf32>
    %35 = vector.broadcast %34 : vector<8x1xf32> to vector<8x8xf32>
    %36 = arith.subf %32, %35 : vector<8x8xf32>
    %37 = math.exp %36 : vector<8x8xf32>
    %cst_28 = arith.constant dense<0.000000e+00> : vector<8xf32>
    %38 = vector.multi_reduction <add>, %37, %cst_28 [1] : vector<8x8xf32> to vector<8xf32>
    %39 = vector.shape_cast %38 : vector<8xf32> to vector<8x1xf32>
    %40 = tpu.reciprocal %39 {approx = true} : vector<8x1xf32> -> vector<8x1xf32>
    %41 = vector.broadcast %40 : vector<8x1xf32> to vector<8x8xf32>
    %42 = arith.mulf %37, %41 : vector<8x8xf32>
    %43 = arith.truncf %42 : vector<8x8xf32> to vector<8x8xbf16>
    %44 = arith.truncf %25 : vector<8x8xf32> to vector<8x8xbf16>
    %cst_29 = arith.constant dense<0.000000e+00> : vector<8x8xf32>
    %45 = tpu.matmul %43, %44, %cst_29 {dimension_numbers = #tpu.dot_dimension_numbers<[1], [0], [0], [1], [0, 0, 1, 1], [], []>} : vector<8x8xbf16>, vector<8x8xbf16>, vector<8x8xf32> -> vector<8x8xf32>
    %46 = arith.truncf %45 : vector<8x8xf32> to vector<8x8xbf16>
    %c0_30 = arith.constant 0 : index
    %c0_31 = arith.constant 0 : index
    %47 = vector.load %arg12[%c0_30, %c0_31] : memref<8x32xbf16, #tpu.memory_space<vmem>>, vector<8x8xbf16>
    tpu.vector_store %arg12[%c0_30, %c0_31], %46 {strides = array<i32>} : memref<8x32xbf16, #tpu.memory_space<vmem>>, vector<8x8xbf16>,
    %c1 = arith.constant 1 : index
    %c0_32 = arith.constant 0 : index
    %c0_33 = arith.constant 0 : index
    %48 = vector.load %arg3[%c1, %c0_32, %c0_33] : memref<4x32x8xbf16, #tpu.memory_space<vmem>>, vector<1x32x8xbf16>
    %49 = vector.shape_cast %48 : vector<1x32x8xbf16> to vector<32x8xbf16>
    %cst_34 = arith.constant dense<0.000000e+00> : vector<8x8xf32>
    %50 = tpu.matmul %2, %49, %cst_34 {dimension_numbers = #tpu.dot_dimension_numbers<[1], [0], [0], [1], [0, 0, 1, 1], [], []>} : vector<8x32xbf16>, vector<32x8xbf16>, vector<8x8xf32> -> vector<8x8xf32>
    %c1_35 = arith.constant 1 : index
    %c0_36 = arith.constant 0 : index
    %c0_37 = arith.constant 0 : index
    %51 = vector.load %arg4[%c1_35, %c0_36, %c0_37] : memref<4x1x8xf32, #tpu.memory_space<vmem>>, vector<1x1x8xf32>
    %52 = vector.shape_cast %51 : vector<1x1x8xf32> to vector<1x8xf32>
    %53 = vector.broadcast %52 : vector<1x8xf32> to vector<8x8xf32>
    %54 = arith.addf %50, %53 : vector<8x8xf32>
    %c1_38 = arith.constant 1 : index
    %c0_39 = arith.constant 0 : index
    %c0_40 = arith.constant 0 : index
    %55 = vector.load %arg5[%c1_38, %c0_39, %c0_40] : memref<4x32x8xbf16, #tpu.memory_space<vmem>>, vector<1x32x8xbf16>
    %56 = vector.shape_cast %55 : vector<1x32x8xbf16> to vector<32x8xbf16>
    %cst_41 = arith.constant dense<0.000000e+00> : vector<8x8xf32>
    %57 = tpu.matmul %2, %56, %cst_41 {dimension_numbers = #tpu.dot_dimension_numbers<[1], [0], [0], [1], [0, 0, 1, 1], [], []>} : vector<8x32xbf16>, vector<32x8xbf16>, vector<8x8xf32> -> vector<8x8xf32>
    %c1_42 = arith.constant 1 : index
    %c0_43 = arith.constant 0 : index
    %c0_44 = arith.constant 0 : index
    %58 = vector.load %arg6[%c1_42, %c0_43, %c0_44] : memref<4x1x8xf32, #tpu.memory_space<vmem>>, vector<1x1x8xf32>
    %59 = vector.shape_cast %58 : vector<1x1x8xf32> to vector<1x8xf32>
    %60 = vector.broadcast %59 : vector<1x8xf32> to vector<8x8xf32>
    %61 = arith.addf %57, %60 : vector<8x8xf32>
    %c1_45 = arith.constant 1 : index
    %c0_46 = arith.constant 0 : index
    %c0_47 = arith.constant 0 : index
    %62 = vector.load %arg7[%c1_45, %c0_46, %c0_47] : memref<4x32x8xbf16, #tpu.memory_space<vmem>>, vector<1x32x8xbf16>
    %63 = vector.shape_cast %62 : vector<1x32x8xbf16> to vector<32x8xbf16>
    %cst_48 = arith.constant dense<0.000000e+00> : vector<8x8xf32>
    %64 = tpu.matmul %2, %63, %cst_48 {dimension_numbers = #tpu.dot_dimension_numbers<[1], [0], [0], [1], [0, 0, 1, 1], [], []>} : vector<8x32xbf16>, vector<32x8xbf16>, vector<8x8xf32> -> vector<8x8xf32>
    %c1_49 = arith.constant 1 : index
    %c0_50 = arith.constant 0 : index
    %c0_51 = arith.constant 0 : index
    %65 = vector.load %arg8[%c1_49, %c0_50, %c0_51] : memref<4x1x8xf32, #tpu.memory_space<vmem>>, vector<1x1x8xf32>
    %66 = vector.shape_cast %65 : vector<1x1x8xf32> to vector<1x8xf32>
    %67 = vector.broadcast %66 : vector<1x8xf32> to vector<8x8xf32>
    %68 = arith.addf %64, %67 : vector<8x8xf32>
    %cst_52 = arith.constant 0.353553385 : f32
    %69 = vector.broadcast %cst_52 : f32 to vector<8x8xf32>
    %70 = arith.mulf %54, %69 : vector<8x8xf32>
    %71 = arith.truncf %70 : vector<8x8xf32> to vector<8x8xbf16>
    %72 = arith.truncf %61 : vector<8x8xf32> to vector<8x8xbf16>
    %cst_53 = arith.constant dense<0.000000e+00> : vector<8x8xf32>
    %73 = tpu.matmul %71, %72, %cst_53 {dimension_numbers = #tpu.dot_dimension_numbers<[1], [1], [0], [0], [0, 0, 1, 0], [], []>} : vector<8x8xbf16>, vector<8x8xbf16>, vector<8x8xf32> -> vector<8x8xf32>
    %74 = vector.broadcast %4 : vector<1x8xf32> to vector<8x8xf32>
    %75 = arith.addf %73, %74 : vector<8x8xf32>
    %cst_54 = arith.constant dense<0xFF800000> : vector<8xf32>
    %76 = vector.multi_reduction <maximumf>, %75, %cst_54 [1] : vector<8x8xf32> to vector<8xf32>
    %77 = vector.shape_cast %76 : vector<8xf32> to vector<8x1xf32>
    %78 = vector.broadcast %77 : vector<8x1xf32> to vector<8x8xf32>
    %79 = arith.subf %75, %78 : vector<8x8xf32>
    %80 = math.exp %79 : vector<8x8xf32>
    %cst_55 = arith.constant dense<0.000000e+00> : vector<8xf32>
    %81 = vector.multi_reduction <add>, %80, %cst_55 [1] : vector<8x8xf32> to vector<8xf32>
    %82 = vector.shape_cast %81 : vector<8xf32> to vector<8x1xf32>
    %83 = tpu.reciprocal %82 {approx = true} : vector<8x1xf32> -> vector<8x1xf32>
    %84 = vector.broadcast %83 : vector<8x1xf32> to vector<8x8xf32>
    %85 = arith.mulf %80, %84 : vector<8x8xf32>
    %86 = arith.truncf %85 : vector<8x8xf32> to vector<8x8xbf16>
    %87 = arith.truncf %68 : vector<8x8xf32> to vector<8x8xbf16>
    %cst_56 = arith.constant dense<0.000000e+00> : vector<8x8xf32>
    %88 = tpu.matmul %86, %87, %cst_56 {dimension_numbers = #tpu.dot_dimension_numbers<[1], [0], [0], [1], [0, 0, 1, 1], [], []>} : vector<8x8xbf16>, vector<8x8xbf16>, vector<8x8xf32> -> vector<8x8xf32>
    %89 = arith.truncf %88 : vector<8x8xf32> to vector<8x8xbf16>
    %c0_57 = arith.constant 0 : index
    %c8 = arith.constant 8 : index
    %90 = vector.load %arg12[%c0_57, %c8] : memref<8x32xbf16, #tpu.memory_space<vmem>>, vector<8x8xbf16>
    tpu.vector_store %arg12[%c0_57, %c8], %89 {strides = array<i32>} : memref<8x32xbf16, #tpu.memory_space<vmem>>, vector<8x8xbf16>,
    %c2 = arith.constant 2 : index
    %c0_58 = arith.constant 0 : index
    %c0_59 = arith.constant 0 : index
    %91 = vector.load %arg3[%c2, %c0_58, %c0_59] : memref<4x32x8xbf16, #tpu.memory_space<vmem>>, vector<1x32x8xbf16>
    %92 = vector.shape_cast %91 : vector<1x32x8xbf16> to vector<32x8xbf16>
    %cst_60 = arith.constant dense<0.000000e+00> : vector<8x8xf32>
    %93 = tpu.matmul %2, %92, %cst_60 {dimension_numbers = #tpu.dot_dimension_numbers<[1], [0], [0], [1], [0, 0, 1, 1], [], []>} : vector<8x32xbf16>, vector<32x8xbf16>, vector<8x8xf32> -> vector<8x8xf32>
    %c2_61 = arith.constant 2 : index
    %c0_62 = arith.constant 0 : index
    %c0_63 = arith.constant 0 : index
    %94 = vector.load %arg4[%c2_61, %c0_62, %c0_63] : memref<4x1x8xf32, #tpu.memory_space<vmem>>, vector<1x1x8xf32>
    %95 = vector.shape_cast %94 : vector<1x1x8xf32> to vector<1x8xf32>
    %96 = vector.broadcast %95 : vector<1x8xf32> to vector<8x8xf32>
    %97 = arith.addf %93, %96 : vector<8x8xf32>
    %c2_64 = arith.constant 2 : index
    %c0_65 = arith.constant 0 : index
    %c0_66 = arith.constant 0 : index
    %98 = vector.load %arg5[%c2_64, %c0_65, %c0_66] : memref<4x32x8xbf16, #tpu.memory_space<vmem>>, vector<1x32x8xbf16>
    %99 = vector.shape_cast %98 : vector<1x32x8xbf16> to vector<32x8xbf16>
    %cst_67 = arith.constant dense<0.000000e+00> : vector<8x8xf32>
    %100 = tpu.matmul %2, %99, %cst_67 {dimension_numbers = #tpu.dot_dimension_numbers<[1], [0], [0], [1], [0, 0, 1, 1], [], []>} : vector<8x32xbf16>, vector<32x8xbf16>, vector<8x8xf32> -> vector<8x8xf32>
    %c2_68 = arith.constant 2 : index
    %c0_69 = arith.constant 0 : index
    %c0_70 = arith.constant 0 : index
    %101 = vector.load %arg6[%c2_68, %c0_69, %c0_70] : memref<4x1x8xf32, #tpu.memory_space<vmem>>, vector<1x1x8xf32>
    %102 = vector.shape_cast %101 : vector<1x1x8xf32> to vector<1x8xf32>
    %103 = vector.broadcast %102 : vector<1x8xf32> to vector<8x8xf32>
    %104 = arith.addf %100, %103 : vector<8x8xf32>
    %c2_71 = arith.constant 2 : index
    %c0_72 = arith.constant 0 : index
    %c0_73 = arith.constant 0 : index
    %105 = vector.load %arg7[%c2_71, %c0_72, %c0_73] : memref<4x32x8xbf16, #tpu.memory_space<vmem>>, vector<1x32x8xbf16>
    %106 = vector.shape_cast %105 : vector<1x32x8xbf16> to vector<32x8xbf16>
    %cst_74 = arith.constant dense<0.000000e+00> : vector<8x8xf32>
    %107 = tpu.matmul %2, %106, %cst_74 {dimension_numbers = #tpu.dot_dimension_numbers<[1], [0], [0], [1], [0, 0, 1, 1], [], []>} : vector<8x32xbf16>, vector<32x8xbf16>, vector<8x8xf32> -> vector<8x8xf32>
    %c2_75 = arith.constant 2 : index
    %c0_76 = arith.constant 0 : index
    %c0_77 = arith.constant 0 : index
    %108 = vector.load %arg8[%c2_75, %c0_76, %c0_77] : memref<4x1x8xf32, #tpu.memory_space<vmem>>, vector<1x1x8xf32>
    %109 = vector.shape_cast %108 : vector<1x1x8xf32> to vector<1x8xf32>
    %110 = vector.broadcast %109 : vector<1x8xf32> to vector<8x8xf32>
    %111 = arith.addf %107, %110 : vector<8x8xf32>
    %cst_78 = arith.constant 0.353553385 : f32
    %112 = vector.broadcast %cst_78 : f32 to vector<8x8xf32>
    %113 = arith.mulf %97, %112 : vector<8x8xf32>
    %114 = arith.truncf %113 : vector<8x8xf32> to vector<8x8xbf16>
    %115 = arith.truncf %104 : vector<8x8xf32> to vector<8x8xbf16>
    %cst_79 = arith.constant dense<0.000000e+00> : vector<8x8xf32>
    %116 = tpu.matmul %114, %115, %cst_79 {dimension_numbers = #tpu.dot_dimension_numbers<[1], [1], [0], [0], [0, 0, 1, 0], [], []>} : vector<8x8xbf16>, vector<8x8xbf16>, vector<8x8xf32> -> vector<8x8xf32>
    %117 = vector.broadcast %4 : vector<1x8xf32> to vector<8x8xf32>
    %118 = arith.addf %116, %117 : vector<8x8xf32>
    %cst_80 = arith.constant dense<0xFF800000> : vector<8xf32>
    %119 = vector.multi_reduction <maximumf>, %118, %cst_80 [1] : vector<8x8xf32> to vector<8xf32>
    %120 = vector.shape_cast %119 : vector<8xf32> to vector<8x1xf32>
    %121 = vector.broadcast %120 : vector<8x1xf32> to vector<8x8xf32>
    %122 = arith.subf %118, %121 : vector<8x8xf32>
    %123 = math.exp %122 : vector<8x8xf32>
    %cst_81 = arith.constant dense<0.000000e+00> : vector<8xf32>
    %124 = vector.multi_reduction <add>, %123, %cst_81 [1] : vector<8x8xf32> to vector<8xf32>
    %125 = vector.shape_cast %124 : vector<8xf32> to vector<8x1xf32>
    %126 = tpu.reciprocal %125 {approx = true} : vector<8x1xf32> -> vector<8x1xf32>
    %127 = vector.broadcast %126 : vector<8x1xf32> to vector<8x8xf32>
    %128 = arith.mulf %123, %127 : vector<8x8xf32>
    %129 = arith.truncf %128 : vector<8x8xf32> to vector<8x8xbf16>
    %130 = arith.truncf %111 : vector<8x8xf32> to vector<8x8xbf16>
    %cst_82 = arith.constant dense<0.000000e+00> : vector<8x8xf32>
    %131 = tpu.matmul %129, %130, %cst_82 {dimension_numbers = #tpu.dot_dimension_numbers<[1], [0], [0], [1], [0, 0, 1, 1], [], []>} : vector<8x8xbf16>, vector<8x8xbf16>, vector<8x8xf32> -> vector<8x8xf32>
    %132 = arith.truncf %131 : vector<8x8xf32> to vector<8x8xbf16>
    %c0_83 = arith.constant 0 : index
    %c16 = arith.constant 16 : index
    %133 = vector.load %arg12[%c0_83, %c16] : memref<8x32xbf16, #tpu.memory_space<vmem>>, vector<8x8xbf16>
    tpu.vector_store %arg12[%c0_83, %c16], %132 {strides = array<i32>} : memref<8x32xbf16, #tpu.memory_space<vmem>>, vector<8x8xbf16>,
    %c3 = arith.constant 3 : index
    %c0_84 = arith.constant 0 : index
    %c0_85 = arith.constant 0 : index
    %134 = vector.load %arg3[%c3, %c0_84, %c0_85] : memref<4x32x8xbf16, #tpu.memory_space<vmem>>, vector<1x32x8xbf16>
    %135 = vector.shape_cast %134 : vector<1x32x8xbf16> to vector<32x8xbf16>
    %cst_86 = arith.constant dense<0.000000e+00> : vector<8x8xf32>
    %136 = tpu.matmul %2, %135, %cst_86 {dimension_numbers = #tpu.dot_dimension_numbers<[1], [0], [0], [1], [0, 0, 1, 1], [], []>} : vector<8x32xbf16>, vector<32x8xbf16>, vector<8x8xf32> -> vector<8x8xf32>
    %c3_87 = arith.constant 3 : index
    %c0_88 = arith.constant 0 : index
    %c0_89 = arith.constant 0 : index
    %137 = vector.load %arg4[%c3_87, %c0_88, %c0_89] : memref<4x1x8xf32, #tpu.memory_space<vmem>>, vector<1x1x8xf32>
    %138 = vector.shape_cast %137 : vector<1x1x8xf32> to vector<1x8xf32>
    %139 = vector.broadcast %138 : vector<1x8xf32> to vector<8x8xf32>
    %140 = arith.addf %136, %139 : vector<8x8xf32>
    %c3_90 = arith.constant 3 : index
    %c0_91 = arith.constant 0 : index
    %c0_92 = arith.constant 0 : index
    %141 = vector.load %arg5[%c3_90, %c0_91, %c0_92] : memref<4x32x8xbf16, #tpu.memory_space<vmem>>, vector<1x32x8xbf16>
    %142 = vector.shape_cast %141 : vector<1x32x8xbf16> to vector<32x8xbf16>
    %cst_93 = arith.constant dense<0.000000e+00> : vector<8x8xf32>
    %143 = tpu.matmul %2, %142, %cst_93 {dimension_numbers = #tpu.dot_dimension_numbers<[1], [0], [0], [1], [0, 0, 1, 1], [], []>} : vector<8x32xbf16>, vector<32x8xbf16>, vector<8x8xf32> -> vector<8x8xf32>
    %c3_94 = arith.constant 3 : index
    %c0_95 = arith.constant 0 : index
    %c0_96 = arith.constant 0 : index
    %144 = vector.load %arg6[%c3_94, %c0_95, %c0_96] : memref<4x1x8xf32, #tpu.memory_space<vmem>>, vector<1x1x8xf32>
    %145 = vector.shape_cast %144 : vector<1x1x8xf32> to vector<1x8xf32>
    %146 = vector.broadcast %145 : vector<1x8xf32> to vector<8x8xf32>
    %147 = arith.addf %143, %146 : vector<8x8xf32>
    %c3_97 = arith.constant 3 : index
    %c0_98 = arith.constant 0 : index
    %c0_99 = arith.constant 0 : index
    %148 = vector.load %arg7[%c3_97, %c0_98, %c0_99] : memref<4x32x8xbf16, #tpu.memory_space<vmem>>, vector<1x32x8xbf16>
    %149 = vector.shape_cast %148 : vector<1x32x8xbf16> to vector<32x8xbf16>
    %cst_100 = arith.constant dense<0.000000e+00> : vector<8x8xf32>
    %150 = tpu.matmul %2, %149, %cst_100 {dimension_numbers = #tpu.dot_dimension_numbers<[1], [0], [0], [1], [0, 0, 1, 1], [], []>} : vector<8x32xbf16>, vector<32x8xbf16>, vector<8x8xf32> -> vector<8x8xf32>
    %c3_101 = arith.constant 3 : index
    %c0_102 = arith.constant 0 : index
    %c0_103 = arith.constant 0 : index
    %151 = vector.load %arg8[%c3_101, %c0_102, %c0_103] : memref<4x1x8xf32, #tpu.memory_space<vmem>>, vector<1x1x8xf32>
    %152 = vector.shape_cast %151 : vector<1x1x8xf32> to vector<1x8xf32>
    %153 = vector.broadcast %152 : vector<1x8xf32> to vector<8x8xf32>
    %154 = arith.addf %150, %153 : vector<8x8xf32>
    %cst_104 = arith.constant 0.353553385 : f32
    %155 = vector.broadcast %cst_104 : f32 to vector<8x8xf32>
    %156 = arith.mulf %140, %155 : vector<8x8xf32>
    %157 = arith.truncf %156 : vector<8x8xf32> to vector<8x8xbf16>
    %158 = arith.truncf %147 : vector<8x8xf32> to vector<8x8xbf16>
    %cst_105 = arith.constant dense<0.000000e+00> : vector<8x8xf32>
    %159 = tpu.matmul %157, %158, %cst_105 {dimension_numbers = #tpu.dot_dimension_numbers<[1], [1], [0], [0], [0, 0, 1, 0], [], []>} : vector<8x8xbf16>, vector<8x8xbf16>, vector<8x8xf32> -> vector<8x8xf32>
    %160 = vector.broadcast %4 : vector<1x8xf32> to vector<8x8xf32>
    %161 = arith.addf %159, %160 : vector<8x8xf32>
    %cst_106 = arith.constant dense<0xFF800000> : vector<8xf32>
    %162 = vector.multi_reduction <maximumf>, %161, %cst_106 [1] : vector<8x8xf32> to vector<8xf32>
    %163 = vector.shape_cast %162 : vector<8xf32> to vector<8x1xf32>
    %164 = vector.broadcast %163 : vector<8x1xf32> to vector<8x8xf32>
    %165 = arith.subf %161, %164 : vector<8x8xf32>
    %166 = math.exp %165 : vector<8x8xf32>
    %cst_107 = arith.constant dense<0.000000e+00> : vector<8xf32>
    %167 = vector.multi_reduction <add>, %166, %cst_107 [1] : vector<8x8xf32> to vector<8xf32>
    %168 = vector.shape_cast %167 : vector<8xf32> to vector<8x1xf32>
    %169 = tpu.reciprocal %168 {approx = true} : vector<8x1xf32> -> vector<8x1xf32>
    %170 = vector.broadcast %169 : vector<8x1xf32> to vector<8x8xf32>
    %171 = arith.mulf %166, %170 : vector<8x8xf32>
    %172 = arith.truncf %171 : vector<8x8xf32> to vector<8x8xbf16>
    %173 = arith.truncf %154 : vector<8x8xf32> to vector<8x8xbf16>
    %cst_108 = arith.constant dense<0.000000e+00> : vector<8x8xf32>
    %174 = tpu.matmul %172, %173, %cst_108 {dimension_numbers = #tpu.dot_dimension_numbers<[1], [0], [0], [1], [0, 0, 1, 1], [], []>} : vector<8x8xbf16>, vector<8x8xbf16>, vector<8x8xf32> -> vector<8x8xf32>
    %175 = arith.truncf %174 : vector<8x8xf32> to vector<8x8xbf16>
    %c0_109 = arith.constant 0 : index
    %c24 = arith.constant 24 : index
    %176 = vector.load %arg12[%c0_109, %c24] : memref<8x32xbf16, #tpu.memory_space<vmem>>, vector<8x8xbf16>
    tpu.vector_store %arg12[%c0_109, %c24], %175 {strides = array<i32>} : memref<8x32xbf16, #tpu.memory_space<vmem>>, vector<8x8xbf16>,
    %c0_110 = arith.constant 0 : index
    %c0_111 = arith.constant 0 : index
    %177 = vector.load %arg12[%c0_110, %c0_111] : memref<8x32xbf16, #tpu.memory_space<vmem>>, vector<8x32xbf16>
    %c0_112 = arith.constant 0 : index
    %c0_113 = arith.constant 0 : index
    %178 = vector.load %arg9[%c0_112, %c0_113] : memref<32x32xbf16, #tpu.memory_space<vmem>>, vector<32x32xbf16>
    %cst_114 = arith.constant dense<0.000000e+00> : vector<8x32xf32>
    %179 = tpu.matmul %177, %178, %cst_114 {dimension_numbers = #tpu.dot_dimension_numbers<[1], [0], [0], [1], [0, 0, 1, 1], [], []>} : vector<8x32xbf16>, vector<32x32xbf16>, vector<8x32xf32> -> vector<8x32xf32>
    %c0_115 = arith.constant 0 : index
    %c0_116 = arith.constant 0 : index
    %180 = vector.load %arg10[%c0_115, %c0_116] : memref<1x32xf32, #tpu.memory_space<vmem>>, vector<1x32xf32>
    %181 = vector.broadcast %180 : vector<1x32xf32> to vector<8x32xf32>
    %182 = arith.addf %179, %181 : vector<8x32xf32>
    %c0_117 = arith.constant 0 : index
    %c0_118 = arith.constant 0 : index
    %c0_119 = arith.constant 0 : index
    %183 = vector.load %arg11[%c0_117, %c0_118, %c0_119] : memref<1x8x32xf32, #tpu.memory_space<vmem>>, vector<1x8x32xf32>
    %184 = vector.shape_cast %183 : vector<1x8x32xf32> to vector<8x32xf32>
    %185 = vector.shape_cast %182 : vector<8x32xf32> to vector<1x8x32xf32>
    tpu.vector_store %arg11[%c0_117, %c0_118, %c0_119], %185 {strides = array<i32>} : memref<1x8x32xf32, #tpu.memory_space<vmem>>, vector<1x8x32xf32>,
    return
  }
  func.func @transform_0(%arg0: i32) -> (i32, i32, i32) {
    %c0_i32 = arith.constant 0 : i32
    %c0_i32_0 = arith.constant 0 : i32
    %c0_i32_1 = arith.constant 0 : i32
    return %arg0, %c0_i32, %c0_i32_0 : i32, i32, i32
  }
  func.func @transform_1(%arg0: i32) -> (i32, i32, i32) {
    %c0_i32 = arith.constant 0 : i32
    %c0_i32_0 = arith.constant 0 : i32
    %c0_i32_1 = arith.constant 0 : i32
    return %arg0, %c0_i32, %c0_i32_0 : i32, i32, i32
  }
  func.func @transform_2(%arg0: i32) -> (i32, i32, i32) {
    %c0_i32 = arith.constant 0 : i32
    %c0_i32_0 = arith.constant 0 : i32
    %c0_i32_1 = arith.constant 0 : i32
    %c0_i32_2 = arith.constant 0 : i32
    return %c0_i32, %c0_i32_0, %c0_i32_1 : i32, i32, i32
  }
  func.func @transform_3(%arg0: i32) -> (i32, i32, i32) {
    %c0_i32 = arith.constant 0 : i32
    %c0_i32_0 = arith.constant 0 : i32
    %c0_i32_1 = arith.constant 0 : i32
    %c0_i32_2 = arith.constant 0 : i32
    return %c0_i32, %c0_i32_0, %c0_i32_1 : i32, i32, i32
  }
  func.func @transform_4(%arg0: i32) -> (i32, i32, i32) {
    %c0_i32 = arith.constant 0 : i32
    %c0_i32_0 = arith.constant 0 : i32
    %c0_i32_1 = arith.constant 0 : i32
    %c0_i32_2 = arith.constant 0 : i32
    return %c0_i32, %c0_i32_0, %c0_i32_1 : i32, i32, i32
  }
  func.func @transform_5(%arg0: i32) -> (i32, i32, i32) {
    %c0_i32 = arith.constant 0 : i32
    %c0_i32_0 = arith.constant 0 : i32
    %c0_i32_1 = arith.constant 0 : i32
    %c0_i32_2 = arith.constant 0 : i32
    return %c0_i32, %c0_i32_0, %c0_i32_1 : i32, i32, i32
  }
  func.func @transform_6(%arg0: i32) -> (i32, i32, i32) {
    %c0_i32 = arith.constant 0 : i32
    %c0_i32_0 = arith.constant 0 : i32
    %c0_i32_1 = arith.constant 0 : i32
    %c0_i32_2 = arith.constant 0 : i32
    return %c0_i32, %c0_i32_0, %c0_i32_1 : i32, i32, i32
  }
  func.func @transform_7(%arg0: i32) -> (i32, i32, i32) {
    %c0_i32 = arith.constant 0 : i32
    %c0_i32_0 = arith.constant 0 : i32
    %c0_i32_1 = arith.constant 0 : i32
    %c0_i32_2 = arith.constant 0 : i32
    return %c0_i32, %c0_i32_0, %c0_i32_1 : i32, i32, i32
  }
  func.func @transform_8(%arg0: i32) -> (i32, i32) {
    %c0_i32 = arith.constant 0 : i32
    %c0_i32_0 = arith.constant 0 : i32
    %c0_i32_1 = arith.constant 0 : i32
    return %c0_i32, %c0_i32_0 : i32, i32
  }
  func.func @transform_9(%arg0: i32) -> (i32, i32) {
    %c0_i32 = arith.constant 0 : i32
    %c0_i32_0 = arith.constant 0 : i32
    %c0_i32_1 = arith.constant 0 : i32
    return %c0_i32, %c0_i32_0 : i32, i32
  }
  func.func @transform_10(%arg0: i32) -> (i32, i32, i32) {
    %c0_i32 = arith.constant 0 : i32
    %c0_i32_0 = arith.constant 0 : i32
    %c0_i32_1 = arith.constant 0 : i32
    return %arg0, %c0_i32, %c0_i32_0 : i32, i32, i32
  }
}

</mosaic_0001>

<bundles_post_ra>
// kernel: attn_encoder.2
= control target key start
LH: loop header
LB: loop body
LE: loop exit
PB: predicated region body
PF: predicated region fallthrough
CT: control target
= control target key end

     0   :  { %s3527_s0 = inlined_call_operand.hbm [shape: f32[2,8,32], index: 0, kind: input, shape index: {}]   ;;  %s3528_s1 = inlined_call_operand.hbm [shape: f32[2,1,8], index: 1, kind: input, shape index: {}]   ;;  %s3529_s2 = inlined_call_operand.hbm [shape: bf16[4,32,8], index: 2, kind: input, shape index: {}]   ;;  %s3530_s3 = inlined_call_operand.hbm [shape: f32[4,1,8], index: 3, kind: input, shape index: {}]   ;;  %s3531_s4 = inlined_call_operand.hbm [shape: bf16[4,32,8], index: 4, kind: input, shape index: {}]   ;;  %s3532_s5 = inlined_call_operand.hbm [shape: f32[4,1,8], index: 5, kind: input, shape index: {}]   ;;  %s3533_s6 = inlined_call_operand.hbm [shape: bf16[4,32,8], index: 6, kind: input, shape index: {}]   ;;  %s3534_s7 = inlined_call_operand.hbm [shape: f32[4,1,8], index: 7, kind: input, shape index: {}]   ;;  %s3535_s8 = inlined_call_operand.hbm [shape: bf16[32,32], index: 8, kind: input, shape index: {}]   ;;  %s3536_s9 = inlined_call_operand.hbm [shape: f32[1,32], index: 9, kind: input, shape index: {}]   ;;  %s3537_s10 = inlined_call_operand.hbm [shape: f32[2,8,32], index: 10, kind: output, shape index: {}]  }
   0x1   :  { %3548 = sst [smem:[#allocation30_spill]] %s3527_s0 }
   0x2   :  { %3549 = sst [smem:[#allocation31_spill]] %s3529_s2 }
   0x3   :  { %3550 = sst [smem:[#allocation32_spill]] %s3530_s3 }
   0x4   :  { %3551 = sst [smem:[#allocation33_spill]] %s3537_s10 }
   0x5   :  { %15 = vsyncpa [#allocation4], 0 }
   0x6   :  { %17 = vsyncpa [#allocation4 + $0x1], 0 }
   0x7   :  { %18 = vsyncpa [#allocation7], 0 }
   0x8   :  { %20 = vsyncpa [#allocation7 + $0x1], 0 }
   0x9   :  { %21 = vsyncpa [#allocation10], 0 }
   0xa   :  { %22 = vsyncpa [#allocation13], 0 }
   0xb   :  { %23 = vsyncpa [#allocation16], 0 }
   0xc   :  { %24 = vsyncpa [#allocation19], 0 }
   0xd   :  { %25 = vsyncpa [#allocation5], 0 }
   0xe   :  { %27 = vsyncpa [#allocation5 + $0x1], 0  ;;  %s2960_s13 = smov 0   ;;  %s2962_s14 = smov 0  }
   0xf   :  { %s2964_s15 = smov 0   ;;  %s2966_s16 = smov 0  }
  0x10 LB: > { %s2885_s17 = smov [#allocation8]   ;;  %s2981_s19 = sadd.s32 4294967295, %s2883_s16   ;;  %s2883_s16 = sphi %s2966_s16, %s3588_s16   ;;  %s2879_s15 = sphi %s2964_s15, %s3587_s15   ;;  %s2875_s14 = sphi %s2962_s14, %s3586_s14   ;;  %s2871_s13 = sphi %s2960_s13, %s3585_s13  }
  0x11   : > { %s296_s18 = sshll.u32 %s2885_s17, 4  ;;  %p2024_p0 = scmp.ge.s32.totalorder %s2883_s16, 1  ;;  %s2986_s18 = int_to_ptr.vmem [resolvable:$true] %s296_s18 }
  0x12   : > { %p3542_p1 = scmp.eq.s32.totalorder %s2981_s19, 0  ;;  %p284_p2 = scmp.lt.s32.totalorder %s2883_s16, 3 }
  0x13   : > { %s2886_s21 = smov [#allocation9]   ;;  %s2887_s24 = smov [#allocation12]  }
  0x14   : > { %p2988_p3 = pnand %p2024_p0, %p284_p2  ;;  %s309_s22 = sshll.u32 %s2886_s21, 4  ;;  %s3001_s22 = int_to_ptr.vmem [resolvable:$true] %s309_s22 }
  0x15   : > { %s3003_s25 = sshll.u32 %s2887_s24, 4  ;;  %s3555_s2 = sld [smem:[#allocation31_spill]]  ;;  %s336_s25 = int_to_ptr.vmem [resolvable:$true] %s3003_s25 }
  0x16   : > { %s3552_s20 = scalar_select %p2988_p3, 1, 0 }
  0x17   : > { %p2364_p5 = pneg %p2988_p3 }
  0x18   : > { %3553 = sst [smem:[#allocation29_spill]] %s3552_s20 }
  0x19   : > { %p2997_p6 = pnand %p2364_p5, %p3542_p1 }
  0x1b   : > { %s2509_s28 = scalar_lea.hbm %s3555_s2, 1024  ;;  %p3013_p8 = pneg %p2997_p6 }
  0x1c   : > { %p2510_p7 = scmp.ne.s32.totalorder %s3555_s2, %s2509_s28  ;;  %p2516_p11 = scmp.lt.u32.totalorder %s2509_s28, %s3555_s2 }
  0x1e   : > { %p2512_p9 = pnand %p3013_p8, %p2510_p7 }
  0x20   : > { %p2513_p10 = pneg %p2512_p9 }
  0x22   : > { %p2518_p12 = pnand %p2516_p11, %p2513_p10 }
  0x24   : > { %2521 = shalt.err (!%p2518_p12)
}
  0x25   : > { %s2522_s21 = scalar_lea.vmem %s2986_s18, 1024  ;;  %p2530_p5 = scmp.lt.s32.totalorder %s2986_s18, %s2986_s18 }
  0x26   : > { %p2523_p13 = scmp.ne.s32.totalorder %s2986_s18, %s2522_s21  ;;  %p2531_p4 = scmp.lt.s32.totalorder %s2522_s21, %s2522_s21 }
  0x28   : > { %p2525_p0 = pnand %p2523_p13, %p3013_p8  ;;  %p2532_p7 = por %p2531_p4, %p2530_p5 }
  0x2a   : > { %p2526_p2 = pneg %p2525_p0 }
  0x2c   : > { %p2533_p9 = pnand %p2532_p7, %p2526_p2 }
  0x2e   : > { %2536 = shalt.err (!%p2533_p9)
}
  0x2f   : > { %s3540_s24 = smov 64   ;;  %s3544_s26 = smov 4  }
  0x30   : > { %2367 = dma.hbm_to_vmem [thread:$0]  (!%p2997_p6), %s3555_s2, 1024, %s2986_s18, [#allocation7], %s3540_s24, %s3540_s24, %s3544_s26  }
  0x31   : > { %s3557_s3 = sld [smem:[#allocation32_spill]] }
  0x37   : > { %s2537_s12 = scalar_lea.hbm %s3557_s3, 64 }
  0x38   : > { %p2538_p4 = scmp.ne.s32.totalorder %s3557_s3, %s2537_s12  ;;  %p2544_p12 = scmp.lt.u32.totalorder %s2537_s12, %s3557_s3 }
  0x3a   : > { %p2540_p10 = pnand %p2538_p4, %p3013_p8 }
  0x3c   : > { %p2541_p11 = pneg %p2540_p10 }
  0x3e   : > { %p2546_p13 = pnand %p2544_p12, %p2541_p11 }
  0x40   : > { %2549 = shalt.err (!%p2546_p13)
}
  0x41   : > { %s2550_s18 = scalar_lea.vmem %s3001_s22, 64  ;;  %p2558_p7 = scmp.lt.s32.totalorder %s3001_s22, %s3001_s22 }
  0x42   : > { %p2551_p0 = scmp.ne.s32.totalorder %s3001_s22, %s2550_s18  ;;  %p2559_p9 = scmp.lt.s32.totalorder %s2550_s18, %s2550_s18 }
  0x44   : > { %p2553_p2 = pnand %p2551_p0, %p3013_p8  ;;  %p2560_p4 = por %p2559_p9, %p2558_p7 }
  0x46   : > { %p2554_p5 = pneg %p2553_p2 }
  0x48   : > { %p2561_p10 = pnand %p2560_p4, %p2554_p5 }
  0x4a   : > { %2564 = shalt.err (!%p2561_p10)
}
  0x4b   : > { %s2890_s27 = smov 16   ;;  %s2891_s10 = smov 1  }
  0x4c   : > { %2370 = dma.hbm_to_vmem [thread:$0]  (!%p2997_p6), %s3557_s3, 64, %s3001_s22, [#allocation10], %s2890_s27, %s2890_s27, %s2891_s10  }
  0x4d   : > { %s2565_s12 = scalar_lea.hbm %s3532_s5, 64 }
  0x4e   : > { %p2566_p11 = scmp.ne.s32.totalorder %s3532_s5, %s2565_s12  ;;  %p2572_p0 = scmp.lt.u32.totalorder %s2565_s12, %s3532_s5 }
  0x50   : > { %p2568_p12 = pnand %p2566_p11, %p3013_p8 }
  0x52   : > { %p2569_p13 = pneg %p2568_p12 }
  0x54   : > { %p2574_p2 = pnand %p2572_p0, %p2569_p13 }
  0x56   : > { %2577 = shalt.err (!%p2574_p2)
}
  0x57   : > { %s2578_s20 = scalar_lea.vmem %s336_s25, 64  ;;  %p2586_p4 = scmp.lt.s32.totalorder %s336_s25, %s336_s25 }
  0x58   : > { %p2579_p5 = scmp.ne.s32.totalorder %s336_s25, %s2578_s20  ;;  %p2587_p10 = scmp.lt.s32.totalorder %s2578_s20, %s2578_s20 }
  0x5a   : > { %p2581_p7 = pnand %p2579_p5, %p3013_p8  ;;  %p2588_p1 = por %p2587_p10, %p2586_p4 }
  0x5c   : > { %p2582_p9 = pneg %p2581_p7 }
  0x5e   : > { %p2589_p3 = pnand %p2588_p1, %p2582_p9 }
  0x60   : > { %2592 = shalt.err (!%p2589_p3)
}
  0x61   : > { %2376 = dma.hbm_to_vmem [thread:$0]  (!%p2997_p6), %s3532_s5, 64, %s336_s25, [#allocation13], %s2890_s27, %s2890_s27, %s2891_s10  }
  0x62   : > { %s2892_s28 = smov [#allocation15]   ;;  %s2893_s30 = smov [#allocation11]  }
  0x63   : > { %s361_s29 = sshll.u32 %s2892_s28, 4  ;;  %s322_s12 = sshll.u32 %s2893_s30, 4  ;;  %s362_s29 = int_to_ptr.vmem [resolvable:$true] %s361_s29  ;;  %s323_s12 = int_to_ptr.vmem [resolvable:$true] %s322_s12 }
  0x64   : > { %s2593_s18 = scalar_lea.hbm %s3534_s7, 64 }
  0x65   : > { %p2594_p1 = scmp.ne.s32.totalorder %s3534_s7, %s2593_s18  ;;  %p2600_p12 = scmp.lt.u32.totalorder %s2593_s18, %s3534_s7 }
  0x67   : > { %p2596_p3 = pnand %p2594_p1, %p3013_p8 }
  0x69   : > { %p2597_p11 = pneg %p2596_p3 }
  0x6b   : > { %p2602_p13 = pnand %p2600_p12, %p2597_p11 }
  0x6d   : > { %2605 = shalt.err (!%p2602_p13)
}
  0x6e   : > { %s2606_s25 = scalar_lea.vmem %s362_s29, 64  ;;  %p2614_p7 = scmp.lt.s32.totalorder %s362_s29, %s362_s29 }
  0x6f   : > { %p2607_p0 = scmp.ne.s32.totalorder %s362_s29, %s2606_s25  ;;  %p2615_p9 = scmp.lt.s32.totalorder %s2606_s25, %s2606_s25 }
  0x71   : > { %p2609_p2 = pnand %p2607_p0, %p3013_p8  ;;  %p2616_p4 = por %p2615_p9, %p2614_p7 }
  0x73   : > { %p2610_p5 = pneg %p2609_p2 }
  0x75   : > { %p2617_p10 = pnand %p2616_p4, %p2610_p5 }
  0x77   : > { %2620 = shalt.err (!%p2617_p10)
}
  0x78   : > { %2382 = dma.hbm_to_vmem [thread:$0]  (!%p2997_p6), %s3534_s7, 64, %s362_s29, [#allocation16], %s2890_s27, %s2890_s27, %s2891_s10  }
  0x79   : > { %s2621_s30 = scalar_lea.hbm %s3531_s4, 1024 }
  0x7a   : > { %p2622_p1 = scmp.ne.s32.totalorder %s3531_s4, %s2621_s30  ;;  %p2628_p12 = scmp.lt.u32.totalorder %s2621_s30, %s3531_s4 }
  0x7c   : > { %p2624_p3 = pnand %p2622_p1, %p3013_p8 }
  0x7e   : > { %p2625_p11 = pneg %p2624_p3 }
  0x80   : > { %p2630_p13 = pnand %p2628_p12, %p2625_p11 }
  0x82   : > { %2633 = shalt.err (!%p2630_p13)
}
  0x83   : > { %s2634_s22 = scalar_lea.vmem %s323_s12, 1024  ;;  %p2642_p7 = scmp.lt.s32.totalorder %s323_s12, %s323_s12 }
  0x84   : > { %p2635_p0 = scmp.ne.s32.totalorder %s323_s12, %s2634_s22  ;;  %p2643_p9 = scmp.lt.s32.totalorder %s2634_s22, %s2634_s22 }
  0x86   : > { %p2637_p2 = pnand %p2635_p0, %p3013_p8  ;;  %p2644_p4 = por %p2643_p9, %p2642_p7 }
  0x88   : > { %p2638_p5 = pneg %p2637_p2 }
  0x8a   : > { %p2645_p10 = pnand %p2644_p4, %p2638_p5 }
  0x8c   : > { %2648 = shalt.err (!%p2645_p10)
}
  0x8d   : > { %s3558_s27 = smov 4   ;;  %s3559_s10 = smov 64  }
  0x8e   : > { %2373 = dma.hbm_to_vmem [thread:$0]  (!%p2997_p6), %s3531_s4, 1024, %s323_s12, [#allocation10], %s3559_s10, %s3559_s10, %s3558_s27  }
  0x8f   : > { %s2894_s2 = smov [#allocation14]   ;;  %s2895_s24 = smov [#allocation17]  }
  0x90   : > { %s348_s26 = sshll.u32 %s2894_s2, 4  ;;  %s374_s28 = sshll.u32 %s2895_s24, 4  ;;  %s349_s26 = int_to_ptr.vmem [resolvable:$true] %s348_s26  ;;  %s375_s28 = int_to_ptr.vmem [resolvable:$true] %s374_s28 }
  0x91   : > { %s2649_s21 = scalar_lea.hbm %s3533_s6, 1024 }
  0x92   : > { %p2650_p1 = scmp.ne.s32.totalorder %s3533_s6, %s2649_s21  ;;  %p2656_p12 = scmp.lt.u32.totalorder %s2649_s21, %s3533_s6 }
  0x94   : > { %p2652_p3 = pnand %p2650_p1, %p3013_p8 }
  0x96   : > { %p2653_p11 = pneg %p2652_p3 }
  0x98   : > { %p2658_p13 = pnand %p2656_p12, %p2653_p11 }
  0x9a   : > { %2661 = shalt.err (!%p2658_p13)
}
  0x9b   : > { %s2662_s12 = scalar_lea.vmem %s349_s26, 1024  ;;  %p2670_p7 = scmp.lt.s32.totalorder %s349_s26, %s349_s26 }
  0x9c   : > { %p2663_p0 = scmp.ne.s32.totalorder %s349_s26, %s2662_s12  ;;  %p2671_p9 = scmp.lt.s32.totalorder %s2662_s12, %s2662_s12 }
  0x9e   : > { %p2665_p2 = pnand %p2663_p0, %p3013_p8  ;;  %p2672_p4 = por %p2671_p9, %p2670_p7 }
  0xa0   : > { %p2666_p5 = pneg %p2665_p2 }
  0xa2   : > { %p2673_p10 = pnand %p2672_p4, %p2666_p5 }
  0xa4   : > { %2676 = shalt.err (!%p2673_p10)
}
  0xa5   : > { %2379 = dma.hbm_to_vmem [thread:$0]  (!%p2997_p6), %s3533_s6, 1024, %s349_s26, [#allocation13], %s3559_s10, %s3559_s10, %s3558_s27  }
  0xa6   : > { %s2677_s17 = scalar_lea.hbm %s3535_s8, 256 }
  0xa7   : > { %p2678_p1 = scmp.ne.s32.totalorder %s3535_s8, %s2677_s17  ;;  %p2684_p12 = scmp.lt.u32.totalorder %s2677_s17, %s3535_s8 }
  0xa9   : > { %p2680_p3 = pnand %p2678_p1, %p3013_p8 }
  0xab   : > { %p2681_p11 = pneg %p2680_p3 }
  0xad   : > { %p2686_p13 = pnand %p2684_p12, %p2681_p11 }
  0xaf   : > { %2689 = shalt.err (!%p2686_p13)
}
  0xb0   : > { %s2690_s29 = scalar_lea.vmem %s375_s28, 256  ;;  %p2698_p7 = scmp.lt.s32.totalorder %s375_s28, %s375_s28 }
  0xb1   : > { %p2691_p0 = scmp.ne.s32.totalorder %s375_s28, %s2690_s29  ;;  %p2699_p9 = scmp.lt.s32.totalorder %s2690_s29, %s2690_s29 }
  0xb3   : > { %p2693_p2 = pnand %p2691_p0, %p3013_p8  ;;  %p2700_p4 = por %p2699_p9, %p2698_p7 }
  0xb5   : > { %p2694_p5 = pneg %p2693_p2 }
  0xb7   : > { %p2701_p10 = pnand %p2700_p4, %p2694_p5 }
  0xb9   : > { %2704 = shalt.err (!%p2701_p10)
}
  0xba   : > { %2385 = dma.hbm_to_vmem [thread:$0]  (!%p2997_p6), %s3535_s8, 256, %s375_s28, [#allocation16], %s3559_s10, %s3559_s10, %s3558_s27  }
  0xbb   : > { %s2896_s25 = smov [#allocation18]   ;;  %s2705_s17 = scalar_lea.hbm %s3536_s9, 16 }
  0xbc   : > { %s388_s2 = sshll.u32 %s2896_s25, 4  ;;  %p2706_p1 = scmp.ne.s32.totalorder %s3536_s9, %s2705_s17  ;;  %s389_s2 = int_to_ptr.vmem [resolvable:$true] %s388_s2 }
  0xbd   : > { %p2712_p12 = scmp.lt.u32.totalorder %s2705_s17, %s3536_s9 }
  0xbe   : > { %p2708_p3 = pnand %p2706_p1, %p3013_p8 }
  0xc0   : > { %p2709_p11 = pneg %p2708_p3 }
  0xc2   : > { %p2714_p13 = pnand %p2712_p12, %p2709_p11 }
  0xc4   : > { %2717 = shalt.err (!%p2714_p13)
}
  0xc5   : > { %s2718_s27 = scalar_lea.vmem %s389_s2, 16  ;;  %s2725_s10 = scalar_lea.vmem %s389_s2, 32 }
  0xc6   : > { %p2719_p0 = scmp.ne.s32.totalorder %s389_s2, %s2718_s27  ;;  %p2726_p7 = scmp.lt.s32.totalorder %s389_s2, %s389_s2 }
  0xc7   : > { %p2727_p9 = scmp.lt.s32.totalorder %s2725_s10, %s2718_s27 }
  0xc8   : > { %p2721_p2 = pnand %p2719_p0, %p3013_p8 }
  0xc9   : > { %p2728_p4 = por %p2727_p9, %p2726_p7 }
  0xca   : > { %p2722_p5 = pneg %p2721_p2 }
  0xcc   : > { %p2729_p10 = pnand %p2728_p4, %p2722_p5 }
  0xce   : > { %2732 = shalt.err (!%p2729_p10)
}
  0xcf   : > { %2388 = dma.hbm_to_vmem [thread:$0]  (!%p2997_p6), %s3536_s9, 16, %s389_s2, [#allocation19]  }
  0xd0   : > { %s2023_s11 = sadd.s32 4294967294, %s2883_s16   ;;  %s3189_s23 = sadd.s32 1, %s2883_s16  }
  0xd1   : > { %s37_s26 = ssub.s32 %s2883_s16, %s3189_s23  ;;  %s40_s12 = sadd.s32 1, %s2879_s15 }
  0xd2   : > { %p38_p8 = scmp.eq.s32.totalorder %s37_s26, 0  ;;  %p47_p1 = scmp.ne.s32.totalorder %s2879_s15, %s2875_s14 }
  0xd3   : > { %p48_p3 = scmp.eq.s32.totalorder %s2883_s16, 0  ;;  %p53_p11 = scmp.ne.s32.totalorder %s2875_s14, %s2871_s13 }
  0xd4   : > { %s3200_s25 = scalar_select %p38_p8, %s2879_s15, %s40_s12  }
  0xd5   : > { %p3202_p12 = por %p48_p3, %p47_p1  ;;  %p3561_p13 = scmp.eq.s32.totalorder %s2981_s19, 0 }
  0xd6   : > { %p271_p0 = scmp.eq.s32.totalorder %s2981_s19, 1  ;;  %p277_p2 = scmp.eq.s32.totalorder %s2023_s11, 1 }
  0xd7   : > { %p3208_p6 = por %p3561_p13, %p53_p11  ;;  %p2408_p5 = scmp.lt.s32.totalorder %s2883_s16, 2 }
  0xd8   : > { %s3215_s30 = sand.u32 1, %s2879_s15   ;;  %p3217_p7 = por %p271_p0, %p47_p1 }
  0xd9   : > { %s3562_s2 = scalar_select %p3208_p6, 1, 0 }
  0xda   : > { %s3563_s17 = scalar_select %p3217_p7, 1, 0 }
  0xdb   : > { %p3221_p9 = por %p277_p2, %p53_p11  ;;  %s2034_s18 = sshll.u32 %s3215_s30, 3 }
  0xdc   : > { %s2035_s20 = sshll.u32 %s2883_s16, 7  ;;  %s3565_s0 = sld [smem:[#allocation30_spill]] }
  0xdd   : > { %s3564_s21 = scalar_select %p3221_p9, 1, 0 }
  0xde   : > { %s403_s28 = scalar_lea.vmem [#allocation3], %s2034_s18  ;;  %p3236_p4 = pnand %p2408_p5, %p3202_p12 }
  0xdf   : > { %s410_s29 = sshll.u32 %s403_s28, 4  ;;  %s400_s12 = scalar_lea.sflag [#allocation4], %s3215_s30  ;;  %s3232_s29 = int_to_ptr.vmem [resolvable:$true] %s410_s29 }
  0xe0   : > { %p2735_p8 = pneg %p3236_p4 }
  0xe2   : > { %s3230_s10 = scalar_lea.hbm %s3565_s0, %s2035_s20  ;;  %s2738_s24 = scalar_lea.hbm %s3565_s0, 256 }
  0xe3   : > { %s2733_s22 = scalar_lea.hbm %s3230_s10, 128  ;;  %p2739_p11 = scmp.lt.u32.totalorder %s3230_s10, %s3565_s0 }
  0xe4   : > { %p2734_p10 = scmp.ne.s32.totalorder %s3230_s10, %s2733_s22  ;;  %p2740_p12 = scmp.lt.u32.totalorder %s2738_s24, %s2733_s22 }
  0xe5   : > { %p2742_p0 = scmp.lt.u32.totalorder %s2733_s22, %s3230_s10 }
  0xe6   : > { %p2736_p1 = pnand %p2735_p8, %p2734_p10  ;;  %p2741_p13 = por %p2740_p12, %p2739_p11 }
  0xe8   : > { %p2737_p3 = pneg %p2736_p1  ;;  %p2743_p2 = por %p2742_p0, %p2741_p13 }
  0xea   : > { %p2744_p5 = pnand %p2743_p2, %p2737_p3 }
  0xec   : > { %2747 = shalt.err (!%p2744_p5)
}
  0xed   : > { %s2748_s26 = scalar_lea.vmem %s3232_s29, 128  ;;  %s2897_s18 = smov [#allocation3]  }
  0xee   : > { %p2749_p10 = scmp.ne.s32.totalorder %s3232_s29, %s2748_s26  ;;  %s2753_s20 = sshll.u32 %s2897_s18, 4  ;;  %s2754_s20 = int_to_ptr.vmem [resolvable:$false] %s2753_s20 }
  0xef   : > { %s2755_s27 = scalar_lea.vmem %s2754_s20, 256  ;;  %p2756_p7 = scmp.lt.s32.totalorder %s3232_s29, %s2754_s20 }
  0xf0   : > { %p2751_p1 = pnand %p2749_p10, %p2735_p8  ;;  %p2757_p11 = scmp.lt.s32.totalorder %s2755_s27, %s2748_s26 }
  0xf2   : > { %p2752_p9 = pneg %p2751_p1  ;;  %p2758_p12 = por %p2757_p11, %p2756_p7 }
  0xf4   : > { %p2759_p13 = pnand %p2758_p12, %p2752_p9 }
  0xf6   : > { %2762 = shalt.err (!%p2759_p13)
}
  0xf7   : > { %2392 = dma.hbm_to_vmem [thread:$0]  (!%p3236_p4), %s3230_s10, 128, %s3232_s29, %s400_s12  }
  0xf8   : > { %s2036_s22 = sshll.u32 %s2883_s16, 4  ;;  %s420_s24 = scalar_lea.vmem [#allocation6], %s3215_s30 }
  0xf9   : > { %s427_s28 = sshll.u32 %s420_s24, 4  ;;  %s3272_s20 = scalar_lea.hbm %s3528_s1, %s2036_s22  ;;  %s428_s28 = int_to_ptr.vmem [resolvable:$true] %s427_s28 }
  0xfa   : > { %s3567_s26 = sand.u32 1, %s2883_s16   ;;  %s2763_s3 = scalar_lea.hbm %s3272_s20, 16 }
  0xfb   : > { %s418_s27 = scalar_lea.sflag [#allocation7], %s3567_s26  ;;  %p2764_p7 = scmp.ne.s32.totalorder %s3272_s20, %s2763_s3 }
  0xfc   : > { %s2768_s29 = scalar_lea.hbm %s3528_s1, 32  ;;  %p2769_p0 = scmp.lt.u32.totalorder %s3272_s20, %s3528_s1 }
  0xfd   : > { %p2766_p9 = pnand %p2764_p7, %p2735_p8  ;;  %p2770_p2 = scmp.lt.u32.totalorder %s2768_s29, %s2763_s3 }
  0xfe   : > { %p2772_p10 = scmp.lt.u32.totalorder %s2763_s3, %s3272_s20 }
  0xff   : > { %p2767_p3 = pneg %p2766_p9  ;;  %p2771_p5 = por %p2770_p2, %p2769_p0 }
 0x101   : > { %p2773_p1 = por %p2772_p10, %p2771_p5 }
 0x103   : > { %p2774_p11 = pnand %p2773_p1, %p2767_p3 }
 0x105   : > { %2777 = shalt.err (!%p2774_p11)
}
 0x106   : > { %s2778_s22 = scalar_lea.vmem %s428_s28, 16  ;;  %s2898_s24 = smov [#allocation6]  }
 0x107   : > { %p2779_p12 = scmp.ne.s32.totalorder %s428_s28, %s2778_s22  ;;  %s2783_s18 = sshll.u32 %s2898_s24, 4  ;;  %s2784_s18 = int_to_ptr.vmem [resolvable:$false] %s2783_s18 }
 0x108   : > { %s2785_s26 = scalar_lea.vmem %s2784_s18, 32  ;;  %p2786_p9 = scmp.lt.s32.totalorder %s428_s28, %s2784_s18 }
 0x109   : > { %p2781_p13 = pnand %p2779_p12, %p2735_p8  ;;  %p2787_p6 = scmp.lt.s32.totalorder %s2785_s26, %s2778_s22 }
 0x10b   : > { %p2782_p7 = pneg %p2781_p13  ;;  %p2788_p0 = por %p2787_p6, %p2786_p9 }
 0x10d   : > { %p2789_p2 = pnand %p2788_p0, %p2782_p7 }
 0x10f   : > { %2792 = shalt.err (!%p2789_p2)
}
 0x110   : > { %2395 = dma.hbm_to_vmem [thread:$0]  (!%p3236_p4), %s3272_s20, 16, %s428_s28, %s418_s27  }
 0x111   : > { %s3568_s3 = sld [smem:[#allocation29_spill]] }
 0x117   : > { %p3569_p3 = scmp.ne.s32.totalorder %s3568_s3, 0 }
 0x118   : > { %s3298_s30 = sand.u32 (!%p3569_p3), 1, %s2875_s14   ;;  %p3570_p6 = scmp.ne.s32.totalorder (!%p3569_p3), %s3562_s2, 0 }
 0x119   : > { %436 = sbr.rel (%p3569_p3) target bundleno = 3922 (0xf52), region = 60  ;;  %s2038_s10 = sshll.u32 (!%p3569_p3), %s3298_s30, 3 }
 0x11a   : > { %s439_s29 = scalar_lea.sflag (!%p3569_p3), [#allocation4], %s3298_s30  ;;  %s3304_s0 = scalar_lea.vmem (!%p3569_p3), [#allocation3], %s2038_s10 }
 0x120   : > { %2838 = dma.done.wait (%p3570_p6), %s439_s29, 128  }
 0x121   : > { %2840 = vsyncadd (%p3570_p6), %s439_s29, 4294967168  ;;  %s447_s11 = sand.u32 1, %s2981_s19   ;;  %s450_s20 = scalar_lea.vmem [#allocation6], %s3298_s30 }
 0x122   : > { %s448_s28 = scalar_lea.sflag [#allocation7], %s447_s11 }
 0x123   : > { %2842 = dma.done.wait (%p3570_p6), %s448_s28, 16  }
 0x124   : > { %2844 = vsyncadd (%p3570_p6), %s448_s28, 4294967280  ;;  %p3571_p4 = scmp.eq.s32.totalorder %s2981_s19, 0 }
 0x126   : > { %2846 = dma.done.wait (%p3571_p4), [#allocation7], 1024   ;;  %p3572_p8 = pmov %p3571_p4 }
 0x127   : > { %p3573_p5 = pmov %p3571_p4 }
 0x128   : > { %2848 = vsyncadd (%p3572_p8), [#allocation7], 4294966272 }
 0x129   : > { %2850 = dma.done.wait (%p3573_p5), [#allocation10], 1088   ;;  %p3574_p10 = pmov %p3571_p4 }
 0x12a   : > { %p3575_p1 = pmov %p3571_p4 }
 0x12b   : > { %2852 = vsyncadd (%p3574_p10), [#allocation10], 4294966208 }
 0x12c   : > { %2854 = dma.done.wait (%p3575_p1), [#allocation13], 1088   ;;  %p3576_p11 = pmov %p3575_p1 }
 0x12d   : > { %p3577_p12 = pmov %p3575_p1 }
 0x12e   : > { %2856 = vsyncadd (%p3576_p11), [#allocation13], 4294966208 }
 0x12f   : > { %2858 = dma.done.wait (%p3577_p12), [#allocation16], 320   ;;  %p3578_p13 = pmov %p3575_p1 }
 0x130   : > { %p3579_p7 = pmov %p3575_p1 }
 0x131   : > { %2860 = vsyncadd (%p3578_p13), [#allocation16], 4294966976 }
 0x132   : > { %2862 = dma.done.wait (%p3579_p7), [#allocation19], 16   ;;  %p3580_p9 = pmov %p3575_p1 }
 0x133   : > { %v2899_v0 = vmov 0.0   ;;  %vm2900_vm0 = vmmov 0   ;;  %v2467_v1 = vld [vmem:[#allocation11] sm:$0xff]   ;;  %v2469_v3 = vld [vmem:[#allocation11 + $0x8] sm:$0xff]   ;;  %vm550_vm1 = vcmask 261120   ;;  %vm729_vm2 = vcmask 64512  }
 0x134   : > { %2864 = vsyncadd (%p3580_p9), [#allocation19], 4294967280  ;;  %2182 = vmatprep.subr.bf16.mxu1 %v2899_v0  ;;  %2174 = vmatprep.subr.bf16.mxu0 %v2899_v0  ;;  %v2468_v2 = vld [vmem:[#allocation8] sm:$0xff]   ;;  %v2470_v4 = vld [vmem:[#allocation8 + $0x8] sm:$0xff]   ;;  %vm792_vm3 = vcmask 1043456   ;;  %vm837_vm4 = vcmask 60416  }
 0x135   : > { %2186 = vmatprep.mubr.msk.bf16.mxu1 %vm2900_vm0, %v2899_v0  ;;  %2178 = vmatprep.mubr.msk.bf16.mxu0 %vm2900_vm0, %v2899_v0  ;;  %v524_v5 = vld [vmem:[%s3304_s0] sm:$0xff]  ;;  %v2052_v7 = vld [vmem:[#allocation12] ss:$0 sm:$0xff]  ;;  %v2048_v8 = vld [vmem:[#allocation9] ss:$0 sm:$0xff]  ;;  %s2901_s2 = smov 8  }
 0x136   : > { %2183 = vmatpush3.bf16.msra.mxu1 %v2467_v1  ;;  %2175 = vmatpush3.bf16.msra.mxu0 %v2468_v2  ;;  %v3345_v6 = vpack.c.bf16 %v524_v5, %v524_v5  ;;  %v2471_v23 = vld [vmem:[#allocation14] sm:$0xff]   ;;  %v2472_v24 = vld [vmem:[#allocation14 + $0x8] sm:$0xff]   ;;  %v2476_v46 = vld [vmem:[#allocation8 + $0x18] sm:$0xff]   ;;  %vm1149_vm5 = vcmask 126016   ;;  %s2902_s27 = smov 16   ;;  %vm1461_vm6 = vcmask 191616  }
 0x137   : > { %2184 = vmatprep.subr.bf16.mxu1 %v2899_v0  ;;  %2176 = vmatprep.subr.bf16.mxu0 %v2899_v0  ;;  %v3370_v25 = vld [vmem:[%s450_s20] ss:$0 sm:$0xff]  ;;  %v2056_v40 = vld [vmem:[#allocation15] ss:$0 sm:$0xff]  ;;  %v2474_v45 = vld [vmem:[#allocation8 + $0x10] sm:$0xff]   ;;  %s2903_s12 = smov 24  }
 0x138   : > { %v2473_v50 = vld [vmem:[#allocation11 + $0x10] sm:$0xff]   ;;  %v2475_v52 = vld [vmem:[#allocation11 + $0x18] sm:$0xff]   ;;  %v2067_v62 = vld [vmem:[#allocation12 + $0x1] ss:$0 sm:$0xff]  ;;  %vm1773_vm7 = vcmask 257216   ;;  %s2113_s22 = sshll.u32 %s2981_s19, 7 }
 0x139   : > { %v2063_v63 = vld [vmem:[#allocation9 + $0x1] ss:$0 sm:$0xff]  ;;  %s522_s24 = scalar_lea.vmem [#allocation20], %s2038_s10  ;;  %s3581_s29 = sld [smem:[#allocation33_spill]] }
 0x13a   : > { %2185 = vmatpush3.bf16.msra.mxu1 %v2469_v3  ;;  %2177 = vmatpush3.bf16.msra.mxu0 %v2470_v4  ;;  %s1857_s18 = sshll.u32 %s522_s24, 4  ;;  %s1844_s19 = scalar_lea.sflag [#allocation5], %s3298_s30  ;;  %s3484_s18 = int_to_ptr.vmem [resolvable:$true] %s1857_s18 }
 0x13b   : > { %2198 = vmatprep.subr.bf16.mxu1 %v2899_v0  ;;  %2190 = vmatprep.subr.bf16.mxu0 %v2899_v0  ;;  %s2793_s10 = scalar_lea.vmem %s3484_s18, 128  ;;  %p3582_p2 = scmp.ne.s32.totalorder %s3563_s17, 0 }
 0x13c   : > { %p2794_p0 = scmp.ne.s32.totalorder %s3484_s18, %s2793_s10  ;;  %s2904_s11 = smov [#allocation20]  }
 0x13d   : > { %2187 = vmatmul.mubr.msk.bf16.vlgmr.msra.gmra.mrb[0].mxu1 %vm550_vm1, %v3345_v6  ;;  %2179 = vmatmul.mubr.msk.bf16.vlgmr.msra.gmra.mrb[0].mxu0 %vm550_vm1, %v3345_v6  ;;  %s2797_s28 = sshll.u32 %s2904_s11, 4  ;;  %s2798_s28 = int_to_ptr.vmem [resolvable:$false] %s2797_s28 }
 0x13e   : > { %2200 = vmatprep.mubr.msk.bf16.mxu1 %vm2900_vm0, %v2899_v0  ;;  %2194 = vmatprep.mubr.msk.bf16.mxu0 %vm2900_vm0, %v2899_v0  ;;  %p2795_p3 = pnand %p2794_p0, %p3582_p2  ;;  %s2799_s20 = scalar_lea.vmem %s2798_s28, 256 }
 0x13f   : > { %2191 = vmatpush3.bf16.msra.mxu0 %v2471_v23  ;;  %s3482_s0 = scalar_lea.hbm %s3581_s29, %s2113_s22  ;;  %p2800_p4 = scmp.lt.s32.totalorder %s3484_s18, %s2798_s28 }
 0x140   : > { %2192 = vmatprep.subr.bf16.mxu0 %v2899_v0  ;;  %p2796_p6 = pneg %p2795_p3  ;;  %p2801_p8 = scmp.lt.s32.totalorder %s2799_s20, %s2793_s10 }
 0x142   : > { %p2802_p5 = por %p2801_p8, %p2800_p4 }
 0x143   : > { %2193 = vmatpush3.bf16.msra.mxu0 %v2472_v24 }
 0x144   : > { %2204 = vmatprep.subr.bf16.mxu0 %v2899_v0  ;;  %p2803_p10 = pnand %p2802_p5, %p2796_p6 }
 0x146   : > { %2195 = vmatmul.mubr.msk.bf16.vlgmr.msra.gmra.mrb[4].mxu0 %vm550_vm1, %v3345_v6 }
 0x147   : > { %2206 = vmatprep.mubr.msk.bf16.mxu0 %vm2900_vm0, %v2899_v0 }
 0x210   : > { %v651_v9 = vpop.f32.mrb[0].mxu1  ;;  %v588_v12 = vpop.f32.mrb[0].mxu0 }
 0x211   : > { %v652_v10 = vadd.f32 %v2052_v7, %v651_v9  ;;  %v2188_v11 = vpop.f32.mrb[1].mxu1  ;;  %v589_v14 = vadd.f32 %v2048_v8, %v588_v12  ;;  %v2180_v15 = vpop.f32.mrb[1].mxu0  ;;  %v2477_v12 = vld [vmem:[#allocation14 + $0x10] sm:$0xff]  }
 0x212   : > { %v654_v13 = vpop.f32.mrb[2].mxu1  ;;  %v591_v18 = vpop.f32.mrb[2].mxu0 }
 0x213   : > { %v722_v16 = vpack.c.bf16 %v652_v10, %v652_v10  ;;  %v2189_v17 = vpop.f32.mrb[3].mxu1  ;;  %v2181_v19 = vpop.f32.mrb[3].mxu0  ;;  %v720_v21 = vmul.f32 0.35355338, %v589_v14  ;;  %v2478_v13 = vld [vmem:[#allocation14 + $0x18] sm:$0xff]  }
 0x215   : > { %v734_v20 = vsel %vm729_vm2, %v722_v16, 0  ;;  %v721_v22 = vpack.c.bf16 %v720_v21, %v720_v21 }
 0x216   : > { %2199 = vmatpush3.bf16.xpose.msra.mxu1 %v734_v20  ;;  %v2071_v20 = vld [vmem:[#allocation15 + $0x1] ss:$0 sm:$0xff] }
 0x217   : > { %2210 = vmatprep.subr.bf16.mxu1 %v2899_v0 }
 0x219   : > { %v714_v37 = vpop.f32.mrb[4].mxu0 }
 0x21a   : > { %v2196_v38 = vpop.f32.mrb[5].mxu0  ;;  %v715_v42 = vadd.f32 %v2056_v40, %v714_v37 }
 0x21b   : > { %v717_v39 = vpop.f32.mrb[6].mxu0 }
 0x21c   : > { %v2197_v41 = vpop.f32.mrb[7].mxu0  ;;  %v788_v43 = vpack.c.bf16 %v715_v42, %v715_v42  ;;  %v2479_v39 = vld [vmem:[#allocation11 + $0x20] sm:$0xff]  }
 0x21d   : > { %2201 = vmatmul.mubr.msk.bf16.vlgmr.msra.gmra.mrb[4].mxu1 %vm729_vm2, %v721_v22  ;;  %v2481_v41 = vld [vmem:[#allocation11 + $0x28] sm:$0xff]  }
 0x21e   : > { %2214 = vmatprep.mubr.msk.bf16.mxu1 %vm2900_vm0, %v2899_v0  ;;  %v794_v44 = vsel %vm792_vm3, %v788_v43, 0  ;;  %2211 = vmatpush3.bf16.msra.mxu1 %v2474_v45 }
 0x21f   : > { %2205 = vmatpush3.bf16.msra.mxu0 %v794_v44  ;;  %2212 = vmatprep.subr.bf16.mxu1 %v2899_v0 }
 0x220   : > { %2218 = vmatprep.subr.bf16.mxu0 %v2899_v0 }
 0x222   : > { %2213 = vmatpush3.bf16.msra.mxu1 %v2476_v46 }
 0x223   : > { %2226 = vmatprep.subr.bf16.mxu1 %v2899_v0 }
 0x225   : > { %2215 = vmatmul.mubr.msk.bf16.vlgmr.msra.gmra.mrb[8].mxu1 %vm550_vm1, %v3345_v6 }
 0x226   : > { %2230 = vmatprep.mubr.msk.bf16.mxu1 %vm2900_vm0, %v2899_v0  ;;  %2227 = vmatpush3.bf16.msra.mxu1 %v2477_v12 }
 0x227   : > { %2228 = vmatprep.subr.bf16.mxu1 %v2899_v0 }
 0x22a   : > { %2229 = vmatpush3.bf16.msra.mxu1 %v2478_v13 }
 0x22b   : > { %2240 = vmatprep.subr.bf16.mxu1 %v2899_v0 }
 0x22d   : > { %2231 = vmatmul.mubr.msk.bf16.vlgmr.msra.gmra.mrb[12].mxu1 %vm550_vm1, %v3345_v6 }
 0x22e   : > { %2242 = vmatprep.mubr.msk.bf16.mxu1 %vm2900_vm0, %v2899_v0 }
 0x2f0   : > { %v770_v26 = vpop.f32.mrb[4].mxu1 }
 0x2f1   : > { %v771_v27 = vadd.f32 %v3370_v25, %v770_v26  ;;  %v2202_v28 = vpop.f32.mrb[5].mxu1 }
 0x2f2   : > { %v773_v29 = vpop.f32.mrb[6].mxu1 }
 0x2f3   : > { %v2203_v30 = vpop.f32.mrb[7].mxu1  ;;  %v776_v31 = vsel %vm729_vm2, %v771_v27, -inf }
 0x2f4   : > { %777 = vmax.xlane.f32.xlu0 %v776_v31 }
 0x2f8   : > { %v898_v53 = vpop.f32.mrb[8].mxu1 }
 0x2f9   : > { %v2216_v54 = vpop.f32.mrb[9].mxu1  ;;  %v899_v4 = vadd.f32 %v2063_v63, %v898_v53  ;;  %v2484_v63 = vld [vmem:[#allocation14 + $0x28] sm:$0xff]  }
 0x2fa   : > { %v901_v55 = vpop.f32.mrb[10].mxu1 }
 0x2fb   : > { %v2217_v56 = vpop.f32.mrb[11].mxu1  ;;  %v1034_v10 = vmul.f32 0.35355338, %v899_v4 }
 0x2fd   : > { %v1035_v11 = vpack.c.bf16 %v1034_v10, %v1034_v10 }
 0x300   : > { %v1028_v21 = vpop.f32.mrb[12].mxu1 }
 0x301   : > { %v1029_v22 = vadd.f32 %v2071_v20, %v1028_v21  ;;  %v2232_v23 = vpop.f32.mrb[13].mxu1  ;;  %v2486_v21 = vld [vmem:[#allocation8 + $0x30] sm:$0xff]  }
 0x302   : > { %v1031_v24 = vpop.f32.mrb[14].mxu1 }
 0x303   : > { %v1095_v26 = vpack.c.bf16 %v1029_v22, %v1029_v22  ;;  %v2488_v22 = vld [vmem:[#allocation8 + $0x38] sm:$0xff]  }
 0x305   : > { %v1100_v28 = vsel %vm792_vm3, %v1095_v26, 0 }
 0x306   : > { %2241 = vmatpush3.bf16.msra.mxu1 %v1100_v28 }
 0x307   : > { %2254 = vmatprep.subr.bf16.mxu1 %v2899_v0 }
 0x381   : > { %v778_v32 = vpop.xlane.xlu0 %777 }
 0x382   : > { %v779_v33 = vsub.f32 %v771_v27, %v778_v32  ;;  %v2233_v27 = vpop.f32.mrb[15].mxu1 }
 0x383   : > { %v2485_v27 = vld [vmem:[#allocation11 + $0x30] sm:$0xff]  }
 0x384   : > { %v780_v34 = vmul.f32 1.442695, %v779_v33 }
 0x386   : > { %2493 = vpow2.f32 %v780_v34  ;;  %v2480_v34 = vld [vmem:[#allocation8 + $0x20] sm:$0xff]  }
 0x390   : > { %v2494_v35 = vpop.eup %2493 }
 0x391   : > { %v782_v36 = vsel %vm729_vm2, %v2494_v35, 0.0 }
 0x392   : > { %783 = vadd.xlane.f32.xlu0 %v782_v36 }
 0x41f   : > { %v784_v47 = vpop.xlane.xlu0 %783 }
 0x420   : > { %2495 = vrcp.f32 %v784_v47 }
 0x42a   : > { %v2496_v48 = vpop.eup %2495 }
 0x42b   : > { %v786_v49 = vmul.f32 %v2496_v48, %v2494_v35  ;;  %v2482_v35 = vld [vmem:[#allocation8 + $0x28] sm:$0xff]  }
 0x42d   : > { %v787_v51 = vpack.c.bf16 %v786_v49, %v786_v49 }
 0x42f   : > { %2207 = vmatmul.mubr.msk.bf16.vlgmr.msra.gmra.mrb[8].mxu0 %vm729_vm2, %v787_v51  ;;  %v2078_v51 = vld [vmem:[#allocation9 + $0x2] ss:$0 sm:$0xff] }
 0x430   : > { %2219 = vmatpush3.bf16.msra.mxu0 %v2473_v50  ;;  %2222 = vmatprep.mubr.msk.bf16.mxu0 %vm2900_vm0, %v2899_v0  ;;  %v2082_v50 = vld [vmem:[#allocation12 + $0x2] ss:$0 sm:$0xff] }
 0x431   : > { %2220 = vmatprep.subr.bf16.mxu0 %v2899_v0 }
 0x434   : > { %2221 = vmatpush3.bf16.msra.mxu0 %v2475_v52 }
 0x435   : > { %2234 = vmatprep.subr.bf16.mxu0 %v2899_v0 }
 0x437   : > { %2223 = vmatmul.mubr.msk.bf16.vlgmr.msra.gmra.mrb[12].mxu0 %vm550_vm1, %v3345_v6 }
 0x438   : > { %2236 = vmatprep.mubr.msk.bf16.mxu0 %vm2900_vm0, %v2899_v0 }
 0x502   : > { %v830_v57 = vpop.f32.mrb[8].mxu0 }
 0x503   : > { %v836_v58 = vpack.c.bf16 %v830_v57, %v830_v57  ;;  %v2208_v59 = vpop.f32.mrb[9].mxu0 }
 0x504   : > { %v833_v60 = vpop.f32.mrb[10].mxu0 }
 0x505   : > { %838 = vst.msk [vmem:[#allocation2] sm:$0xf] %vm837_vm4, %v836_v58  ;;  %v2209_v61 = vpop.f32.mrb[11].mxu0 }
 0x50a   : > { %v963_v1 = vpop.f32.mrb[12].mxu0 }
 0x50b   : > { %v964_v2 = vadd.f32 %v2067_v62, %v963_v1  ;;  %v2224_v3 = vpop.f32.mrb[13].mxu0  ;;  %v2483_v62 = vld [vmem:[#allocation14 + $0x20] sm:$0xff]  }
 0x50c   : > { %v966_v5 = vpop.f32.mrb[14].mxu0 }
 0x50d   : > { %v1036_v7 = vpack.c.bf16 %v964_v2, %v964_v2  ;;  %v2225_v8 = vpop.f32.mrb[15].mxu0 }
 0x50f   : > { %v1041_v9 = vsel %vm729_vm2, %v1036_v7, 0 }
 0x510   : > { %2235 = vmatpush3.bf16.xpose.msra.mxu0 %v1041_v9 }
 0x511   : > { %2246 = vmatprep.subr.bf16.mxu0 %v2899_v0 }
 0x517   : > { %2237 = vmatmul.mubr.msk.bf16.vlgmr.msra.gmra.mrb[16].mxu0 %vm729_vm2, %v1035_v11 }
 0x518   : > { %2250 = vmatprep.mubr.msk.bf16.mxu0 %vm2900_vm0, %v2899_v0  ;;  %2247 = vmatpush3.bf16.msra.mxu0 %v2480_v34 }
 0x519   : > { %2248 = vmatprep.subr.bf16.mxu0 %v2899_v0 }
 0x51c   : > { %2249 = vmatpush3.bf16.msra.mxu0 %v2482_v35 }
 0x51d   : > { %2262 = vmatprep.subr.bf16.mxu0 %v2899_v0 }
 0x51f   : > { %2251 = vmatmul.mubr.msk.bf16.vlgmr.msra.gmra.mrb[20].mxu0 %vm550_vm1, %v3345_v6 }
 0x520   : > { %2266 = vmatprep.mubr.msk.bf16.mxu0 %vm2900_vm0, %v2899_v0  ;;  %2263 = vmatpush3.bf16.msra.mxu0 %v2483_v62 }
 0x521   : > { %2264 = vmatprep.subr.bf16.mxu0 %v2899_v0 }
 0x524   : > { %2265 = vmatpush3.bf16.msra.mxu0 %v2484_v63 }
 0x525   : > { %2276 = vmatprep.subr.bf16.mxu0 %v2899_v0 }
 0x527   : > { %2267 = vmatmul.mubr.msk.bf16.vlgmr.msra.gmra.mrb[24].mxu0 %vm550_vm1, %v3345_v6 }
 0x528   : > { %2278 = vmatprep.mubr.msk.bf16.mxu0 %vm2900_vm0, %v2899_v0 }
 0x5ea   : > { %v1077_v14 = vpop.f32.mrb[16].mxu0 }
 0x5eb   : > { %v1078_v15 = vadd.f32 %v3370_v25, %v1077_v14  ;;  %v2238_v16 = vpop.f32.mrb[17].mxu0 }
 0x5ec   : > { %v1080_v17 = vpop.f32.mrb[18].mxu0  ;;  %v2086_v16 = vld [vmem:[#allocation15 + $0x2] ss:$0 sm:$0xff] }
 0x5ed   : > { %v2239_v18 = vpop.f32.mrb[19].mxu0  ;;  %v1083_v19 = vsel %vm729_vm2, %v1078_v15, -inf }
 0x5ee   : > { %1084 = vmax.xlane.f32.xlu1 %v1083_v19 }
 0x5f2   : > { %v1210_v42 = vpop.f32.mrb[20].mxu0 }
 0x5f3   : > { %v2252_v43 = vpop.f32.mrb[21].mxu0  ;;  %v1211_v55 = vadd.f32 %v2078_v51, %v1210_v42  ;;  %v2489_v51 = vld [vmem:[#allocation14 + $0x30] sm:$0xff]  }
 0x5f4   : > { %v1213_v44 = vpop.f32.mrb[22].mxu0 }
 0x5f5   : > { %v2253_v45 = vpop.f32.mrb[23].mxu0  ;;  %v1346_v60 = vmul.f32 0.35355338, %v1211_v55 }
 0x5f7   : > { %v1347_v61 = vpack.c.bf16 %v1346_v60, %v1346_v60  ;;  %v2101_v60 = vld [vmem:[#allocation15 + $0x3] ss:$0 sm:$0xff] }
 0x5fa   : > { %v1340_v13 = vpop.f32.mrb[24].mxu0 }
 0x5fb   : > { %v2268_v14 = vpop.f32.mrb[25].mxu0  ;;  %v1341_v18 = vadd.f32 %v2086_v16, %v1340_v13  ;;  %v2492_v16 = vld [vmem:[#allocation17 + $0x8] sm:$0xff]  }
 0x5fd   : > { %v1407_v19 = vpack.c.bf16 %v1341_v18, %v1341_v18 }
 0x5ff   : > { %v1412_v20 = vsel %vm792_vm3, %v1407_v19, 0 }
 0x600   : > { %2277 = vmatpush3.bf16.msra.mxu0 %v1412_v20 }
 0x601   : > { %2290 = vmatprep.subr.bf16.mxu0 %v2899_v0 }
 0x67b   : > { %v1085_v29 = vpop.xlane.xlu1 %1084 }
 0x67c   : > { %v1086_v30 = vsub.f32 %v1078_v15, %v1085_v29  ;;  %v1343_v15 = vpop.f32.mrb[26].mxu0  ;;  %v2487_v29 = vld [vmem:[#allocation11 + $0x38] sm:$0xff]  }
 0x67d   : > { %v2269_v17 = vpop.f32.mrb[27].mxu0  ;;  %v2491_v15 = vld [vmem:[#allocation17] sm:$0xff]  }
 0x67e   : > { %v1087_v31 = vmul.f32 1.442695, %v1086_v30 }
 0x680   : > { %2497 = vpow2.f32 %v1087_v31 }
 0x68a   : > { %v2498_v32 = vpop.eup %2497 }
 0x68b   : > { %v1089_v33 = vsel %vm729_vm2, %v2498_v32, 0.0 }
 0x68c   : > { %1090 = vadd.xlane.f32.xlu1 %v1089_v33 }
 0x719   : > { %v1091_v36 = vpop.xlane.xlu1 %1090 }
 0x71a   : > { %2499 = vrcp.f32 %v1091_v36 }
 0x724   : > { %v2500_v37 = vpop.eup %2499 }
 0x725   : > { %v1093_v38 = vmul.f32 %v2500_v37, %v2498_v32 }
 0x727   : > { %v1094_v40 = vpack.c.bf16 %v1093_v38, %v1093_v38  ;;  %v2097_v38 = vld [vmem:[#allocation12 + $0x3] ss:$0 sm:$0xff] }
 0x729   : > { %2243 = vmatmul.mubr.msk.bf16.vlgmr.msra.gmra.mrb[16].mxu1 %vm729_vm2, %v1094_v40 }
 0x72a   : > { %2255 = vmatpush3.bf16.msra.mxu1 %v2479_v39  ;;  %2258 = vmatprep.mubr.msk.bf16.mxu1 %vm2900_vm0, %v2899_v0  ;;  %v2093_v39 = vld [vmem:[#allocation9 + $0x3] ss:$0 sm:$0xff] }
 0x72b   : > { %2256 = vmatprep.subr.bf16.mxu1 %v2899_v0 }
 0x72e   : > { %2257 = vmatpush3.bf16.msra.mxu1 %v2481_v41 }
 0x72f   : > { %2270 = vmatprep.subr.bf16.mxu1 %v2899_v0 }
 0x731   : > { %2259 = vmatmul.mubr.msk.bf16.vlgmr.msra.gmra.mrb[20].mxu1 %vm550_vm1, %v3345_v6 }
 0x732   : > { %2272 = vmatprep.mubr.msk.bf16.mxu1 %vm2900_vm0, %v2899_v0 }
 0x7fc   : > { %v3423_v46 = vpop.f32.mrb[16].mxu1 }
 0x7fd   : > { %v2244_v47 = vpop.f32.mrb[17].mxu1 }
 0x7fe   : > { %v1139_v48 = vpop.f32.mrb[18].mxu1 }
 0x7ff   : > { %v2245_v49 = vpop.f32.mrb[19].mxu1 }
 0x804   : > { %v1275_v52 = vpop.f32.mrb[20].mxu1 }
 0x805   : > { %v1276_v53 = vadd.f32 %v2082_v50, %v1275_v52  ;;  %v2260_v54 = vpop.f32.mrb[21].mxu1  ;;  %v2490_v52 = vld [vmem:[#allocation14 + $0x38] sm:$0xff]  }
 0x806   : > { %v1278_v56 = vpop.f32.mrb[22].mxu1 }
 0x807   : > { %v1348_v57 = vpack.c.bf16 %v1276_v53, %v1276_v53  ;;  %v2261_v58 = vpop.f32.mrb[23].mxu1 }
 0x809   : > { %v1353_v59 = vsel %vm729_vm2, %v1348_v57, 0 }
 0x80a   : > { %2271 = vmatpush3.bf16.xpose.msra.mxu1 %v1353_v59  ;;  %v2116_v59 = vpack.c.bf16 %v3423_v46, %v3423_v46 }
 0x80b   : > { %2282 = vmatprep.subr.bf16.mxu1 %v2899_v0 }
 0x811   : > { %2273 = vmatmul.mubr.msk.bf16.vlgmr.msra.gmra.mrb[24].mxu1 %vm729_vm2, %v1347_v61 }
 0x812   : > { %2286 = vmatprep.mubr.msk.bf16.mxu1 %vm2900_vm0, %v2899_v0  ;;  %2283 = vmatpush3.bf16.msra.mxu1 %v2486_v21 }
 0x813   : > { %2284 = vmatprep.subr.bf16.mxu1 %v2899_v0 }
 0x816   : > { %2285 = vmatpush3.bf16.msra.mxu1 %v2488_v22 }
 0x817   : > { %2298 = vmatprep.subr.bf16.mxu1 %v2899_v0 }
 0x819   : > { %2287 = vmatmul.mubr.msk.bf16.vlgmr.msra.gmra.mrb[28].mxu1 %vm550_vm1, %v3345_v6 }
 0x81a   : > { %2302 = vmatprep.mubr.msk.bf16.mxu1 %vm2900_vm0, %v2899_v0  ;;  %2299 = vmatpush3.bf16.msra.mxu1 %v2489_v51 }
 0x81b   : > { %2300 = vmatprep.subr.bf16.mxu1 %v2899_v0 }
 0x81e   : > { %2301 = vmatpush3.bf16.msra.mxu1 %v2490_v52 }
 0x81f   : > { %2312 = vmatprep.subr.bf16.mxu1 %v2899_v0 }
 0x821   : > { %2303 = vmatmul.mubr.msk.bf16.vlgmr.msra.gmra.mrb[32].mxu1 %vm550_vm1, %v3345_v6 }
 0x822   : > { %2314 = vmatprep.mubr.msk.bf16.mxu1 %vm2900_vm0, %v2899_v0 }
 0x8e4   : > { %v1389_v1 = vpop.f32.mrb[24].mxu1 }
 0x8e5   : > { %v1390_v2 = vadd.f32 %v3370_v25, %v1389_v1  ;;  %v2274_v3 = vpop.f32.mrb[25].mxu1 }
 0x8e6   : > { %v1392_v4 = vpop.f32.mrb[26].mxu1 }
 0x8e7   : > { %v2275_v5 = vpop.f32.mrb[27].mxu1  ;;  %v1395_v7 = vsel %vm729_vm2, %v1390_v2, -inf }
 0x8e8   : > { %1396 = vmax.xlane.f32.xlu0 %v1395_v7 }
 0x8ec   : > { %v1522_v30 = vpop.f32.mrb[28].mxu1 }
 0x8ed   : > { %v2288_v31 = vpop.f32.mrb[29].mxu1  ;;  %v1523_v43 = vadd.f32 %v2093_v39, %v1522_v30 }
 0x8ee   : > { %v1525_v32 = vpop.f32.mrb[30].mxu1 }
 0x8ef   : > { %v2289_v33 = vpop.f32.mrb[31].mxu1  ;;  %v1658_v49 = vmul.f32 0.35355338, %v1523_v43 }
 0x8f1   : > { %v1659_v50 = vpack.c.bf16 %v1658_v49, %v1658_v49 }
 0x8f4   : > { %v1652_v61 = vpop.f32.mrb[32].mxu1 }
 0x8f5   : > { %v2304_v62 = vpop.f32.mrb[33].mxu1 }
 0x8f6   : > { %v1655_v63 = vpop.f32.mrb[34].mxu1 }
 0x975   : > { %v1397_v8 = vpop.xlane.xlu0 %1396 }
 0x976   : > { %v1398_v9 = vsub.f32 %v1390_v2, %v1397_v8  ;;  %v2305_v2 = vpop.f32.mrb[35].mxu1 }
 0x978   : > { %v1399_v10 = vmul.f32 1.442695, %v1398_v9 }
 0x97a   : > { %2501 = vpow2.f32 %v1399_v10 }
 0x984   : > { %v2502_v11 = vpop.eup %2501 }
 0x985   : > { %v1401_v12 = vsel %vm729_vm2, %v2502_v11, 0.0 }
 0x986   : > { %1402 = vadd.xlane.f32.xlu1 %v1401_v12 }
 0xa13   : > { %v1403_v23 = vpop.xlane.xlu1 %1402 }
 0xa14   : > { %2503 = vrcp.f32 %v1403_v23 }
 0xa1e   : > { %v2504_v24 = vpop.eup %2503 }
 0xa1f   : > { %v1405_v26 = vmul.f32 %v2504_v24, %v2502_v11  ;;  %v2108_v24 = vld [vmem:[#allocation18] ss:$0 sm:$0xff] }
 0xa21   : > { %v1406_v28 = vpack.c.bf16 %v1405_v26, %v1405_v26 }
 0xa23   : > { %2279 = vmatmul.mubr.msk.bf16.vlgmr.msra.gmra.mrb[28].mxu0 %vm729_vm2, %v1406_v28 }
 0xa24   : > { %2291 = vmatpush3.bf16.msra.mxu0 %v2485_v27  ;;  %2294 = vmatprep.mubr.msk.bf16.mxu0 %vm2900_vm0, %v2899_v0 }
 0xa25   : > { %2292 = vmatprep.subr.bf16.mxu0 %v2899_v0 }
 0xa28   : > { %2293 = vmatpush3.bf16.msra.mxu0 %v2487_v29 }
 0xa29   : > { %2306 = vmatprep.subr.bf16.mxu0 %v2899_v0 }
 0xa2b   : > { %2295 = vmatmul.mubr.msk.bf16.vlgmr.msra.gmra.mrb[32].mxu0 %vm550_vm1, %v3345_v6  ;;  %v1653_v6 = vadd.f32 %v2101_v60, %v1652_v61 }
 0xa2c   : > { %2308 = vmatprep.mubr.msk.bf16.mxu0 %vm2900_vm0, %v2899_v0 }
 0xa2d   : > { %v1719_v1 = vpack.c.bf16 %v1653_v6, %v1653_v6 }
 0xaf6   : > { %v1448_v34 = vpop.f32.mrb[28].mxu0 }
 0xaf7   : > { %v2280_v35 = vpop.f32.mrb[29].mxu0  ;;  %v2117_v9 = vpack.c.bf16 %v1448_v34, %v1448_v34 }
 0xaf8   : > { %v1451_v36 = vpop.f32.mrb[30].mxu0 }
 0xaf9   : > { %v2281_v37 = vpop.f32.mrb[31].mxu0 }
 0xafe   : > { %v1587_v40 = vpop.f32.mrb[32].mxu0 }
 0xaff   : > { %v1588_v41 = vadd.f32 %v2097_v38, %v1587_v40  ;;  %v2296_v42 = vpop.f32.mrb[33].mxu0 }
 0xb00   : > { %v1590_v44 = vpop.f32.mrb[34].mxu0 }
 0xb01   : > { %v1660_v45 = vpack.c.bf16 %v1588_v41, %v1588_v41  ;;  %v2297_v47 = vpop.f32.mrb[35].mxu0 }
 0xb03   : > { %v1665_v48 = vsel %vm729_vm2, %v1660_v45, 0 }
 0xb04   : > { %2307 = vmatpush3.bf16.xpose.msra.mxu0 %v1665_v48 }
 0xb05   : > { %2318 = vmatprep.subr.bf16.mxu0 %v2899_v0 }
 0xb0b   : > { %2309 = vmatmul.mubr.msk.bf16.vlgmr.msra.gmra.mrb[36].mxu0 %vm729_vm2, %v1659_v50 }
 0xb0c   : > { %2322 = vmatprep.mubr.msk.bf16.mxu0 %vm2900_vm0, %v2899_v0  ;;  %2319 = vmatpush3.bf16.msra.mxu0 %v2491_v15 }
 0xb0d   : > { %2320 = vmatprep.subr.bf16.mxu0 %v2899_v0 }
 0xb10   : > { %2321 = vmatpush3.bf16.msra.mxu0 %v2492_v16 }
 0xbde   : > { %v1701_v53 = vpop.f32.mrb[36].mxu0 }
 0xbdf   : > { %v1702_v54 = vadd.f32 %v3370_v25, %v1701_v53  ;;  %v2310_v55 = vpop.f32.mrb[37].mxu0  ;;  %v1724_v25 = vsel %vm792_vm3, %v1719_v1, 0 }
 0xbe0   : > { %v1704_v56 = vpop.f32.mrb[38].mxu0  ;;  %2313 = vmatpush3.bf16.msra.mxu1 %v1724_v25 }
 0xbe1   : > { %v2311_v57 = vpop.f32.mrb[39].mxu0  ;;  %v1707_v58 = vsel %vm729_vm2, %v1702_v54, -inf }
 0xbe2   : > { %1708 = vmax.xlane.f32.xlu0 %v1707_v58 }
 0xbf8   : > { %1146 = vrot.lane.b32.xlu0 %v2116_v59, %s2901_s2 }
 0xc6f   : > { %v1709_v3 = vpop.xlane.xlu0 %1708 }
 0xc70   : > { %v1710_v4 = vsub.f32 %v1702_v54, %v1709_v3 }
 0xc72   : > { %v1711_v5 = vmul.f32 1.442695, %v1710_v4 }
 0xc73   : > { %v1147_v7 = vpop.permute.xlu0 %1146 }
 0xc74   : > { %2505 = vpow2.f32 %v1711_v5  ;;  %1150 = vst.msk [vmem:[#allocation2] sm:$0xf] %vm1149_vm5, %v1147_v7 }
 0xc7e   : > { %v2506_v46 = vpop.eup %2505 }
 0xc7f   : > { %v1713_v8 = vsel %vm729_vm2, %v2506_v46, 0.0 }
 0xc80   : > { %1714 = vadd.xlane.f32.xlu1 %v1713_v8 }
 0xc91   : > { %1458 = vrot.lane.b32.xlu1 %v2117_v9, %s2902_s27 }
 0xd0d   : > { %v1715_v10 = vpop.xlane.xlu1 %1714 }
 0xd0e   : > { %2507 = vrcp.f32 %v1715_v10 }
 0xd11   : > { %v1459_v11 = vpop.permute.xlu1 %1458 }
 0xd12   : > { %1462 = vst.msk [vmem:[#allocation2] sm:$0xf] %vm1461_vm6, %v1459_v11 }
 0xd18   : > { %v2508_v12 = vpop.eup %2507 }
 0xd19   : > { %v1717_v13 = vmul.f32 %v2508_v12, %v2506_v46 }
 0xd1b   : > { %v1718_v14 = vpack.c.bf16 %v1717_v13, %v1717_v13 }
 0xd1d   : > { %2315 = vmatmul.mubr.msk.bf16.vlgmr.msra.gmra.mrb[36].mxu1 %vm729_vm2, %v1718_v14 }
 0xdf0   : > { %v1760_v17 = vpop.f32.mrb[36].mxu1 }
 0xdf1   : > { %v2118_v18 = vpack.c.bf16 %v1760_v17, %v1760_v17  ;;  %v2316_v19 = vpop.f32.mrb[37].mxu1 }
 0xdf2   : > { %v1763_v20 = vpop.f32.mrb[38].mxu1 }
 0xdf3   : > { %1770 = vrot.lane.b32.xlu1 %v2118_v18, %s2903_s12  ;;  %v2317_v21 = vpop.f32.mrb[39].mxu1 }
 0xe65   : > { %v1771_v22 = vpop.permute.xlu1 %1770 }
 0xe66   : > { %1774 = vst.msk [vmem:[#allocation2] sm:$0xf] %vm1773_vm7, %v1771_v22 }
 0xe6d   : > { %v1775_v23 = vld [vmem:[#allocation2] sm:$0xf] }
 0xe6e   : > { %2323 = vmatmul.mubr.msk.bf16.vlgmr.msra.gmra.mrb[40].mxu0 %vm550_vm1, %v1775_v23 }
 0xf41   : > { %v1836_v0 = vpop.f32.mrb[40].mxu0 }
 0xf42   : > { %v1837_v26 = vadd.f32 %v2108_v24, %v1836_v0  ;;  %v2324_v27 = vpop.f32.mrb[41].mxu0 }
 0xf43   : > { %v1839_v28 = vpop.f32.mrb[42].mxu0 }
 0xf44   : > { %v2325_v29 = vpop.f32.mrb[43].mxu0  ;;  %1842 = vst.msk [vmem:[%s522_s24] sm:$0xff] %vm550_vm1, %v1837_v26 }
 0xf45   : > { %2806 = shalt.err (!%p2803_p10)
}
 0xf46   : > { %s2807_s30 = scalar_lea.hbm %s3482_s0, 128  ;;  %s2811_s12 = scalar_lea.hbm %s3581_s29, 256 }
 0xf47   : > { %p2808_p1 = scmp.ne.s32.totalorder %s3482_s0, %s2807_s30  ;;  %p2812_p13 = scmp.lt.u32.totalorder %s3482_s0, %s3581_s29 }
 0xf48   : > { %p2813_p7 = scmp.lt.u32.totalorder %s2811_s12, %s2807_s30  ;;  %p2815_p0 = scmp.lt.u32.totalorder %s2807_s30, %s3482_s0 }
 0xf49   : > { %p2809_p11 = pnand %p2808_p1, %p3582_p2 }
 0xf4a   : > { %p2814_p9 = por %p2813_p7, %p2812_p13 }
 0xf4b   : > { %p2810_p12 = pneg %p2809_p11 }
 0xf4c   : > { %p2816_p3 = por %p2815_p0, %p2814_p9 }
 0xf4e   : > { %p2817_p6 = pnand %p2816_p3, %p2810_p12 }
 0xf50   : > { %2820 = shalt.err (!%p2817_p6)
}
 0xf51   : > { %2362 = dma.vmem_to_hbm [thread:$0]  (%p3582_p2), %s3484_s18, 128, %s3482_s0, %s1844_s19  }
 0xf52 PF: > { %s1869_s26 = sand.u32 1, %s2871_s13   ;;  %p3583_p4 = scmp.ne.s32.totalorder %s3564_s21, 0 }
 0xf53   : > { %p3584_p8 = scmp.ge.s32.totalorder %s2883_s16, 2  ;;  %s1870_s3 = scalar_lea.sflag [#allocation5], %s1869_s26 }
 0xf55   : > { %p2397_p5 = pnand %p3584_p8, %p3583_p4 }
 0xf57   : > { %2866 = dma.done.wait (!%p2397_p5), %s1870_s3, 128  }
 0xf58   : > { %2868 = vsyncadd (!%p2397_p5), %s1870_s3, 4294967168  ;;  %p30_p10 = scmp.ge.s32.totalorder %s3189_s23, 4   ;;  %s3585_s13 = smov %s2875_s14 }
 0xf59   : > { %s3586_s14 = smov %s2879_s15  ;;  %s3587_s15 = smov %s3200_s25 }
 0xf5a   : > { %s3588_s16 = smov %s3189_s23  ;;  %32 = sbr.rel (!%p30_p10) target bundleno = 16 (0x10), region = 168 }
 0xf61   :  { %1875 = vsyncpa [#allocation4], 1 }
 0xf62   :  { %1877 = vsyncpa [#allocation4 + $0x1], 1 }
 0xf63   :  { %1878 = vsyncpa [#allocation7], 1 }
 0xf64   :  { %1880 = vsyncpa [#allocation7 + $0x1], 1 }
 0xf65   :  { %1881 = vsyncpa [#allocation10], 1 }
 0xf66   :  { %1882 = vsyncpa [#allocation13], 1 }
 0xf67   :  { %1883 = vsyncpa [#allocation16], 1 }
 0xf68   :  { %1884 = vsyncpa [#allocation19], 1 }
 0xf69   :  { %1885 = vsyncpa [#allocation5], 1 }
 0xf6a   :  { %1887 = vsyncpa [#allocation5 + $0x1], 1 }

</bundles_post_ra>
